<compile_context>
chip_gen: v7x
topology: tpu7x:2x2x1
jax: 0.10.0
libtpu: 0.0.40
codegen_flags: <defaults>
</compile_context>

<pallas_src>
from typing import NamedTuple

import jax
import jax.numpy as jnp
from jax.experimental import pallas as pl
from jax.experimental.pallas import tpu as pltpu


def _round_up(x, m):
    return ((x + m - 1) // m) * m


# ---------------------------------------------------------------------------
# Kernel: one batch tile of the full 6-layer autoencoder forward pass.
# bf16 matmul operands (MXU-native), f32 accumulation / bias / ReLU epilogue.
# ---------------------------------------------------------------------------
def ae_kernel(x_ref,
              w1, b1, w2, b2, w3, b3,      # encoder params (bf16 W, f32 b)
              w4, b4, w5, b5, w6, b6,      # decoder params
              xhat_ref, z_ref):

    def layer(h_bf16, w_ref, b_ref, relu):
        acc = jnp.dot(h_bf16, w_ref[...],
                      preferred_element_type=jnp.float32) + b_ref[...]
        if relu:
            acc = jnp.maximum(acc, 0.0)
        return acc  # f32

    x = x_ref[...].astype(jnp.bfloat16)

    # encoder
    h = layer(x, w1, b1, relu=True).astype(jnp.bfloat16)
    h = layer(h, w2, b2, relu=True).astype(jnp.bfloat16)
    z = layer(h, w3, b3, relu=False)                      # f32 latent
    z_ref[...] = z.astype(z_ref.dtype)

    # decoder (consumes f32 z; downcast only as matmul operand)
    h = layer(z.astype(jnp.bfloat16), w4, b4, relu=True).astype(jnp.bfloat16)
    h = layer(h, w5, b5, relu=True).astype(jnp.bfloat16)
    x_hat = layer(h, w6, b6, relu=False)
    xhat_ref[...] = x_hat.astype(xhat_ref.dtype)


# ---------------------------------------------------------------------------
# Parameter handling
# ---------------------------------------------------------------------------
class PackedAEParams(NamedTuple):
    tensors: tuple      # 12 arrays: lane-padded bf16 weights / f32 biases
    input_dim: int
    latent_dim: int
    in_pad: int
    lat_pad: int


def init_params(key, input_dim, latent_dim, dtype=jnp.float32):
    """nn.Linear default init (uniform +/- 1/sqrt(fan_in)); W stored [in, out]."""
    dims = [(input_dim, 256), (256, 128), (128, latent_dim),
            (latent_dim, 128), (128, 256), (256, input_dim)]
    params = []
    for fan_in, fan_out in dims:
        key, kw, kb = jax.random.split(key, 3)
        bound = 1.0 / (fan_in ** 0.5)
        w = jax.random.uniform(kw, (fan_in, fan_out), dtype, -bound, bound)
        b = jax.random.uniform(kb, (1, fan_out), dtype, -bound, bound)
        params += [w, b]
    return params


def pack_params(params):
    """One-time lane-dense (multiple-of-128) zero padding + bf16 cast of the
    weights (biases stay f32). Hoisted out of the per-call forward path."""
    w1, b1, w2, b2, w3, b3, w4, b4, w5, b5, w6, b6 = params
    input_dim = int(w1.shape[0])
    latent_dim = int(w3.shape[1])
    in_pad = _round_up(input_dim, 128)
    lat_pad = _round_up(latent_dim, 128)
    f32, bf16 = jnp.float32, jnp.bfloat16

    def pad2(a, rows, cols, dtype):
        r, c = a.shape
        return jnp.pad(a.astype(dtype), ((0, rows - r), (0, cols - c)))

    tensors = (
        pad2(w1, in_pad, 256, bf16),   b1.astype(f32),
        w2.astype(bf16),               b2.astype(f32),
        pad2(w3, 128, lat_pad, bf16),  pad2(b3, 1, lat_pad, f32),
        pad2(w4, lat_pad, 128, bf16),  b4.astype(f32),
        w5.astype(bf16),               b5.astype(f32),
        pad2(w6, 256, in_pad, bf16),   pad2(b6, 1, in_pad, f32),
    )
    tensors = tuple(jax.device_put(t) for t in tensors)
    jax.block_until_ready(tensors)
    return PackedAEParams(tensors, input_dim, latent_dim, in_pad, lat_pad)


def _select_tile(batch, max_tile_b):
    aligned = _round_up(batch, 16)       # bf16 sublane tile is (16, 128)
    if aligned >= max_tile_b:
        tile_b = max_tile_b
    else:
        tile_b = aligned
        # Once there is enough work, use >=2 grid steps so the "parallel"
        # batch axis can be sharded across both v7x TensorCores.
        if tile_b >= 64 and tile_b % 32 == 0:
            tile_b //= 2
    b_pad = _round_up(batch, tile_b)
    return tile_b, b_pad


# ---------------------------------------------------------------------------
# Forward pass wrapper
# ---------------------------------------------------------------------------
def custom_ae_forward(x, packed, *, max_tile_b=512,
                      xhat_dtype=jnp.bfloat16, z_dtype=jnp.float32):
    B, input_dim = x.shape
    assert input_dim == packed.input_dim
    in_pad, lat_pad = packed.in_pad, packed.lat_pad
    latent_dim = packed.latent_dim

    tile_b, b_pad = _select_tile(B, max_tile_b)
    grid = (b_pad // tile_b,)

    # Only touch x in the wrapper when padding is actually required; otherwise
    # hand it to the kernel as-is (cast to bf16 in-kernel, no extra HBM pass).
    if b_pad != B or in_pad != input_dim:
        x_in = jnp.pad(x.astype(jnp.bfloat16),
                       ((0, b_pad - B), (0, in_pad - input_dim)))
    else:
        x_in = x

    x_spec = pl.BlockSpec((tile_b, in_pad), lambda i: (i, 0))
    out_shape = (
        jax.ShapeDtypeStruct((b_pad, in_pad), xhat_dtype),   # x_hat (padded)
        jax.ShapeDtypeStruct((b_pad, lat_pad), z_dtype),     # z (padded, f32)
    )
    out_specs = (
        pl.BlockSpec((tile_b, in_pad), lambda i: (i, 0)),
        pl.BlockSpec((tile_b, lat_pad), lambda i: (i, 0)),
    )

    flops = 2 * b_pad * (in_pad * 256 + 256 * 128 + 128 * lat_pad
                         + lat_pad * 128 + 128 * 256 + 256 * in_pad)
    param_bytes = sum(int(p.size) * p.dtype.itemsize for p in packed.tensors)
    bytes_accessed = (int(x_in.size) * x_in.dtype.itemsize + param_bytes
                      + b_pad * in_pad * jnp.dtype(xhat_dtype).itemsize
                      + b_pad * lat_pad * jnp.dtype(z_dtype).itemsize)
    cost = pl.CostEstimate(flops=int(flops), transcendentals=0,
                           bytes_accessed=int(bytes_accessed))

    # VMEM budget sized from the actual footprint (<< v5e's 16 MiB default).
    act_bytes = tile_b * (2 * in_pad * x_in.dtype.itemsize
                          + 2 * in_pad * jnp.dtype(xhat_dtype).itemsize
                          + 2 * lat_pad * jnp.dtype(z_dtype).itemsize
                          + 4 * 256 * 4)                     # f32 intermediates
    vmem_limit = max(8 << 20,
                     _round_up(2 * param_bytes + act_bytes, 1 << 20) + (2 << 20))

    compiler_params = pltpu.CompilerParams(
        dimension_semantics=("parallel",),   # megacore batch split (v7x)
        vmem_limit_bytes=int(vmem_limit),
    )

    def call(single_buffer_params):
        if single_buffer_params:
            # Params never change (constant index map) -> single buffer.
            param_specs = [pl.BlockSpec(p.shape, lambda i: (0, 0),
                                        pipeline_mode=pl.Buffered(1))
                           for p in packed.tensors]
        else:
            param_specs = [pl.BlockSpec(p.shape, lambda i: (0, 0))
                           for p in packed.tensors]
        return pl.pallas_call(
            ae_kernel,
            out_shape=out_shape,
            grid=grid,
            in_specs=[x_spec] + param_specs,
            out_specs=out_specs,
            compiler_params=compiler_params,
            cost_estimate=cost,
        )(x_in, *packed.tensors)

    try:
        xhat_p, z_p = call(True)
    except Exception:   # fall back if Buffered(1) is rejected by this lowering
        xhat_p, z_p = call(False)

    x_hat = xhat_p if (b_pad == B and in_pad == input_dim) else xhat_p[:B, :input_dim]
    z = z_p if (b_pad == B and lat_pad == latent_dim) else z_p[:B, :latent_dim]
    return x_hat, z


# ---------------------------------------------------------------------------
# References
# ---------------------------------------------------------------------------
def reference_forward_matched(x, params):
    """Pure-JAX reference with the kernel's precision policy
    (bf16 matmul operands, f32 accumulation, f32 bias+ReLU)."""
    w1, b1, w2, b2, w3, b3, w4, b4, w5, b5, w6, b6 = params
    bf16, f32 = jnp.bfloat16, jnp.float32

    def layer(h, w, b, relu):
        acc = jnp.dot(h.astype(bf16), w.astype(bf16),
                      preferred_element_type=f32) + b.astype(f32)
        return jnp.maximum(acc, 0.0) if relu else acc

    h = layer(x, w1, b1, True)
    h = layer(h, w2, b2, True)
    z = layer(h, w3, b3, False)
    h = layer(z, w4, b4, True)
    h = layer(h, w5, b5, True)
    x_hat = layer(h, w6, b6, False)
    return x_hat, z


def reference_forward_f32(x, params):
    w1, b1, w2, b2, w3, b3, w4, b4, w5, b5, w6, b6 = params
    h = jnp.maximum(x @ w1 + b1, 0.0)
    h = jnp.maximum(h @ w2 + b2, 0.0)
    z = h @ w3 + b3
    h = jnp.maximum(z @ w4 + b4, 0.0)
    h = jnp.maximum(h @ w5 + b5, 0.0)
    x_hat = h @ w6 + b6
    return x_hat, z


if __name__ == "__main__":
    input_dim, latent_dim = 64, 32

    key = jax.random.PRNGKey(0)
    key, kx, kx2 = jax.random.split(key, 3)
    params = init_params(key, input_dim, latent_dim)
    packed = pack_params(params)     # one-time padding / bf16 cast (hoisted)

    # --- small batch (B=8): adaptive tile -> single 16-row step --------------
    x = jax.random.normal(kx, (8, input_dim), jnp.float32)
    x_hat, z = custom_ae_forward(x, packed)
    jax.block_until_ready((x_hat, z))
    assert x_hat.shape == (8, input_dim) and z.shape == (8, latent_dim)

    # exact-policy reference (bf16 operands, f32 accumulate)
    xm, zm = reference_forward_matched(x, params)
    assert jnp.allclose(z, zm, atol=2e-3, rtol=2e-3)
    assert jnp.allclose(x_hat.astype(jnp.float32), xm, atol=3e-2, rtol=3e-2)

    # loose sanity vs pure-f32 math (covers bf16 operand rounding)
    xf, zf = reference_forward_f32(x, params)
    assert jnp.allclose(x_hat.astype(jnp.float32), xf, atol=1.5e-1, rtol=1.5e-1)
    assert jnp.allclose(z, zf, atol=1.5e-1, rtol=1.5e-1)

    # --- larger batch (B=64): exercises the 2-step "parallel" grid path ------
    x2 = jax.random.normal(kx2, (64, input_dim), jnp.float32)
    x_hat2, z2 = custom_ae_forward(x2, packed)
    jax.block_until_ready((x_hat2, z2))
    assert x_hat2.shape == (64, input_dim) and z2.shape == (64, latent_dim)
    xm2, zm2 = reference_forward_matched(x2, params)
    assert jnp.allclose(z2, zm2, atol=2e-3, rtol=2e-3)
    assert jnp.allclose(x_hat2.astype(jnp.float32), xm2, atol=3e-2, rtol=3e-2)

    print("KERNEL_OK")
</pallas_src>

<mosaic_0001>
module attributes {stable_mosaic.version = 11 : i64} {
  func.func @ae_kernel(%arg0: i32, %arg1: memref<16x128xbf16, #tpu.memory_space<vmem>>, %arg2: memref<128x256xbf16, #tpu.memory_space<vmem>>, %arg3: memref<1x256xf32, #tpu.memory_space<vmem>>, %arg4: memref<256x128xbf16, #tpu.memory_space<vmem>>, %arg5: memref<1x128xf32, #tpu.memory_space<vmem>>, %arg6: memref<128x128xbf16, #tpu.memory_space<vmem>>, %arg7: memref<1x128xf32, #tpu.memory_space<vmem>>, %arg8: memref<128x128xbf16, #tpu.memory_space<vmem>>, %arg9: memref<1x128xf32, #tpu.memory_space<vmem>>, %arg10: memref<128x256xbf16, #tpu.memory_space<vmem>>, %arg11: memref<1x256xf32, #tpu.memory_space<vmem>>, %arg12: memref<256x128xbf16, #tpu.memory_space<vmem>>, %arg13: memref<1x128xf32, #tpu.memory_space<vmem>>, %arg14: memref<16x128xbf16, #tpu.memory_space<vmem>>, %arg15: memref<16x128xf32, #tpu.memory_space<vmem>>) attributes {dimension_semantics = [#tpu.dimension_semantics<parallel>], iteration_bounds = array<i64: 1>, scalar_prefetch = 0 : i64, scratch_operands = 0 : i64, tpu.core_type = #tpu.core_type<tc>, window_params = [{transform_indices = @transform_0, window_bounds = array<i64: 16, 128>}, {pipeline_mode = #tpu.pipeline_mode<synchronous>, transform_indices = @transform_1, window_bounds = array<i64: 128, 256>}, {pipeline_mode = #tpu.pipeline_mode<synchronous>, transform_indices = @transform_2, window_bounds = array<i64: 1, 256>}, {pipeline_mode = #tpu.pipeline_mode<synchronous>, transform_indices = @transform_3, window_bounds = array<i64: 256, 128>}, {pipeline_mode = #tpu.pipeline_mode<synchronous>, transform_indices = @transform_4, window_bounds = array<i64: 1, 128>}, {pipeline_mode = #tpu.pipeline_mode<synchronous>, transform_indices = @transform_5, window_bounds = array<i64: 128, 128>}, {pipeline_mode = #tpu.pipeline_mode<synchronous>, transform_indices = @transform_6, window_bounds = array<i64: 1, 128>}, {pipeline_mode = #tpu.pipeline_mode<synchronous>, transform_indices = @transform_7, window_bounds = array<i64: 128, 128>}, {pipeline_mode = #tpu.pipeline_mode<synchronous>, transform_indices = @transform_8, window_bounds = array<i64: 1, 128>}, {pipeline_mode = #tpu.pipeline_mode<synchronous>, transform_indices = @transform_9, window_bounds = array<i64: 128, 256>}, {pipeline_mode = #tpu.pipeline_mode<synchronous>, transform_indices = @transform_10, window_bounds = array<i64: 1, 256>}, {pipeline_mode = #tpu.pipeline_mode<synchronous>, transform_indices = @transform_11, window_bounds = array<i64: 256, 128>}, {pipeline_mode = #tpu.pipeline_mode<synchronous>, transform_indices = @transform_12, window_bounds = array<i64: 1, 128>}, {transform_indices = @transform_13, window_bounds = array<i64: 16, 128>}, {transform_indices = @transform_14, window_bounds = array<i64: 16, 128>}]} {
    %c0 = arith.constant 0 : index
    %c0_0 = arith.constant 0 : index
    %0 = vector.load %arg1[%c0, %c0_0] : memref<16x128xbf16, #tpu.memory_space<vmem>>, vector<16x128xbf16>
    %c0_1 = arith.constant 0 : index
    %c0_2 = arith.constant 0 : index
    %1 = vector.load %arg2[%c0_1, %c0_2] : memref<128x256xbf16, #tpu.memory_space<vmem>>, vector<128x256xbf16>
    %cst = arith.constant dense<0.000000e+00> : vector<16x256xf32>
    %2 = tpu.matmul %0, %1, %cst {dimension_numbers = #tpu.dot_dimension_numbers<[1], [0], [0], [1], [0, 0, 1, 1], [], []>} : vector<16x128xbf16>, vector<128x256xbf16>, vector<16x256xf32> -> vector<16x256xf32>
    %c0_3 = arith.constant 0 : index
    %c0_4 = arith.constant 0 : index
    %3 = vector.load %arg3[%c0_3, %c0_4] : memref<1x256xf32, #tpu.memory_space<vmem>>, vector<1x256xf32>
    %4 = vector.broadcast %3 : vector<1x256xf32> to vector<16x256xf32>
    %5 = arith.addf %2, %4 : vector<16x256xf32>
    %cst_5 = arith.constant 0.000000e+00 : f32
    %6 = vector.broadcast %cst_5 : f32 to vector<16x256xf32>
    %7 = arith.maximumf %5, %6 : vector<16x256xf32>
    %8 = arith.truncf %7 : vector<16x256xf32> to vector<16x256xbf16>
    %c0_6 = arith.constant 0 : index
    %c0_7 = arith.constant 0 : index
    %9 = vector.load %arg4[%c0_6, %c0_7] : memref<256x128xbf16, #tpu.memory_space<vmem>>, vector<256x128xbf16>
    %cst_8 = arith.constant dense<0.000000e+00> : vector<16x128xf32>
    %10 = tpu.matmul %8, %9, %cst_8 {dimension_numbers = #tpu.dot_dimension_numbers<[1], [0], [0], [1], [0, 0, 1, 1], [], []>} : vector<16x256xbf16>, vector<256x128xbf16>, vector<16x128xf32> -> vector<16x128xf32>
    %c0_9 = arith.constant 0 : index
    %c0_10 = arith.constant 0 : index
    %11 = vector.load %arg5[%c0_9, %c0_10] : memref<1x128xf32, #tpu.memory_space<vmem>>, vector<1x128xf32>
    %12 = vector.broadcast %11 : vector<1x128xf32> to vector<16x128xf32>
    %13 = arith.addf %10, %12 : vector<16x128xf32>
    %cst_11 = arith.constant 0.000000e+00 : f32
    %14 = vector.broadcast %cst_11 : f32 to vector<16x128xf32>
    %15 = arith.maximumf %13, %14 : vector<16x128xf32>
    %16 = arith.truncf %15 : vector<16x128xf32> to vector<16x128xbf16>
    %c0_12 = arith.constant 0 : index
    %c0_13 = arith.constant 0 : index
    %17 = vector.load %arg6[%c0_12, %c0_13] : memref<128x128xbf16, #tpu.memory_space<vmem>>, vector<128x128xbf16>
    %cst_14 = arith.constant dense<0.000000e+00> : vector<16x128xf32>
    %18 = tpu.matmul %16, %17, %cst_14 {dimension_numbers = #tpu.dot_dimension_numbers<[1], [0], [0], [1], [0, 0, 1, 1], [], []>} : vector<16x128xbf16>, vector<128x128xbf16>, vector<16x128xf32> -> vector<16x128xf32>
    %c0_15 = arith.constant 0 : index
    %c0_16 = arith.constant 0 : index
    %19 = vector.load %arg7[%c0_15, %c0_16] : memref<1x128xf32, #tpu.memory_space<vmem>>, vector<1x128xf32>
    %20 = vector.broadcast %19 : vector<1x128xf32> to vector<16x128xf32>
    %21 = arith.addf %18, %20 : vector<16x128xf32>
    %c0_17 = arith.constant 0 : index
    %c0_18 = arith.constant 0 : index
    %22 = vector.load %arg15[%c0_17, %c0_18] : memref<16x128xf32, #tpu.memory_space<vmem>>, vector<16x128xf32>
    tpu.vector_store %arg15[%c0_17, %c0_18], %21 {strides = array<i32>} : memref<16x128xf32, #tpu.memory_space<vmem>>, vector<16x128xf32>,
    %23 = arith.truncf %21 : vector<16x128xf32> to vector<16x128xbf16>
    %c0_19 = arith.constant 0 : index
    %c0_20 = arith.constant 0 : index
    %24 = vector.load %arg8[%c0_19, %c0_20] : memref<128x128xbf16, #tpu.memory_space<vmem>>, vector<128x128xbf16>
    %cst_21 = arith.constant dense<0.000000e+00> : vector<16x128xf32>
    %25 = tpu.matmul %23, %24, %cst_21 {dimension_numbers = #tpu.dot_dimension_numbers<[1], [0], [0], [1], [0, 0, 1, 1], [], []>} : vector<16x128xbf16>, vector<128x128xbf16>, vector<16x128xf32> -> vector<16x128xf32>
    %c0_22 = arith.constant 0 : index
    %c0_23 = arith.constant 0 : index
    %26 = vector.load %arg9[%c0_22, %c0_23] : memref<1x128xf32, #tpu.memory_space<vmem>>, vector<1x128xf32>
    %27 = vector.broadcast %26 : vector<1x128xf32> to vector<16x128xf32>
    %28 = arith.addf %25, %27 : vector<16x128xf32>
    %cst_24 = arith.constant 0.000000e+00 : f32
    %29 = vector.broadcast %cst_24 : f32 to vector<16x128xf32>
    %30 = arith.maximumf %28, %29 : vector<16x128xf32>
    %31 = arith.truncf %30 : vector<16x128xf32> to vector<16x128xbf16>
    %c0_25 = arith.constant 0 : index
    %c0_26 = arith.constant 0 : index
    %32 = vector.load %arg10[%c0_25, %c0_26] : memref<128x256xbf16, #tpu.memory_space<vmem>>, vector<128x256xbf16>
    %cst_27 = arith.constant dense<0.000000e+00> : vector<16x256xf32>
    %33 = tpu.matmul %31, %32, %cst_27 {dimension_numbers = #tpu.dot_dimension_numbers<[1], [0], [0], [1], [0, 0, 1, 1], [], []>} : vector<16x128xbf16>, vector<128x256xbf16>, vector<16x256xf32> -> vector<16x256xf32>
    %c0_28 = arith.constant 0 : index
    %c0_29 = arith.constant 0 : index
    %34 = vector.load %arg11[%c0_28, %c0_29] : memref<1x256xf32, #tpu.memory_space<vmem>>, vector<1x256xf32>
    %35 = vector.broadcast %34 : vector<1x256xf32> to vector<16x256xf32>
    %36 = arith.addf %33, %35 : vector<16x256xf32>
    %cst_30 = arith.constant 0.000000e+00 : f32
    %37 = vector.broadcast %cst_30 : f32 to vector<16x256xf32>
    %38 = arith.maximumf %36, %37 : vector<16x256xf32>
    %39 = arith.truncf %38 : vector<16x256xf32> to vector<16x256xbf16>
    %c0_31 = arith.constant 0 : index
    %c0_32 = arith.constant 0 : index
    %40 = vector.load %arg12[%c0_31, %c0_32] : memref<256x128xbf16, #tpu.memory_space<vmem>>, vector<256x128xbf16>
    %cst_33 = arith.constant dense<0.000000e+00> : vector<16x128xf32>
    %41 = tpu.matmul %39, %40, %cst_33 {dimension_numbers = #tpu.dot_dimension_numbers<[1], [0], [0], [1], [0, 0, 1, 1], [], []>} : vector<16x256xbf16>, vector<256x128xbf16>, vector<16x128xf32> -> vector<16x128xf32>
    %c0_34 = arith.constant 0 : index
    %c0_35 = arith.constant 0 : index
    %42 = vector.load %arg13[%c0_34, %c0_35] : memref<1x128xf32, #tpu.memory_space<vmem>>, vector<1x128xf32>
    %43 = vector.broadcast %42 : vector<1x128xf32> to vector<16x128xf32>
    %44 = arith.addf %41, %43 : vector<16x128xf32>
    %45 = arith.truncf %44 : vector<16x128xf32> to vector<16x128xbf16>
    %c0_36 = arith.constant 0 : index
    %c0_37 = arith.constant 0 : index
    %46 = vector.load %arg14[%c0_36, %c0_37] : memref<16x128xbf16, #tpu.memory_space<vmem>>, vector<16x128xbf16>
    tpu.vector_store %arg14[%c0_36, %c0_37], %45 {strides = array<i32>} : memref<16x128xbf16, #tpu.memory_space<vmem>>, vector<16x128xbf16>,
    return
  }
  func.func @transform_0(%arg0: i32) -> (i32, i32) {
    %c0_i32 = arith.constant 0 : i32
    %c0_i32_0 = arith.constant 0 : i32
    return %arg0, %c0_i32 : i32, i32
  }
  func.func @transform_1(%arg0: i32) -> (i32, i32) {
    %c0_i32 = arith.constant 0 : i32
    %c0_i32_0 = arith.constant 0 : i32
    %c0_i32_1 = arith.constant 0 : i32
    return %c0_i32, %c0_i32_0 : i32, i32
  }
  func.func @transform_2(%arg0: i32) -> (i32, i32) {
    %c0_i32 = arith.constant 0 : i32
    %c0_i32_0 = arith.constant 0 : i32
    %c0_i32_1 = arith.constant 0 : i32
    return %c0_i32, %c0_i32_0 : i32, i32
  }
  func.func @transform_3(%arg0: i32) -> (i32, i32) {
    %c0_i32 = arith.constant 0 : i32
    %c0_i32_0 = arith.constant 0 : i32
    %c0_i32_1 = arith.constant 0 : i32
    return %c0_i32, %c0_i32_0 : i32, i32
  }
  func.func @transform_4(%arg0: i32) -> (i32, i32) {
    %c0_i32 = arith.constant 0 : i32
    %c0_i32_0 = arith.constant 0 : i32
    %c0_i32_1 = arith.constant 0 : i32
    return %c0_i32, %c0_i32_0 : i32, i32
  }
  func.func @transform_5(%arg0: i32) -> (i32, i32) {
    %c0_i32 = arith.constant 0 : i32
    %c0_i32_0 = arith.constant 0 : i32
    %c0_i32_1 = arith.constant 0 : i32
    return %c0_i32, %c0_i32_0 : i32, i32
  }
  func.func @transform_6(%arg0: i32) -> (i32, i32) {
    %c0_i32 = arith.constant 0 : i32
    %c0_i32_0 = arith.constant 0 : i32
    %c0_i32_1 = arith.constant 0 : i32
    return %c0_i32, %c0_i32_0 : i32, i32
  }
  func.func @transform_7(%arg0: i32) -> (i32, i32) {
    %c0_i32 = arith.constant 0 : i32
    %c0_i32_0 = arith.constant 0 : i32
    %c0_i32_1 = arith.constant 0 : i32
    return %c0_i32, %c0_i32_0 : i32, i32
  }
  func.func @transform_8(%arg0: i32) -> (i32, i32) {
    %c0_i32 = arith.constant 0 : i32
    %c0_i32_0 = arith.constant 0 : i32
    %c0_i32_1 = arith.constant 0 : i32
    return %c0_i32, %c0_i32_0 : i32, i32
  }
  func.func @transform_9(%arg0: i32) -> (i32, i32) {
    %c0_i32 = arith.constant 0 : i32
    %c0_i32_0 = arith.constant 0 : i32
    %c0_i32_1 = arith.constant 0 : i32
    return %c0_i32, %c0_i32_0 : i32, i32
  }
  func.func @transform_10(%arg0: i32) -> (i32, i32) {
    %c0_i32 = arith.constant 0 : i32
    %c0_i32_0 = arith.constant 0 : i32
    %c0_i32_1 = arith.constant 0 : i32
    return %c0_i32, %c0_i32_0 : i32, i32
  }
  func.func @transform_11(%arg0: i32) -> (i32, i32) {
    %c0_i32 = arith.constant 0 : i32
    %c0_i32_0 = arith.constant 0 : i32
    %c0_i32_1 = arith.constant 0 : i32
    return %c0_i32, %c0_i32_0 : i32, i32
  }
  func.func @transform_12(%arg0: i32) -> (i32, i32) {
    %c0_i32 = arith.constant 0 : i32
    %c0_i32_0 = arith.constant 0 : i32
    %c0_i32_1 = arith.constant 0 : i32
    return %c0_i32, %c0_i32_0 : i32, i32
  }
  func.func @transform_13(%arg0: i32) -> (i32, i32) {
    %c0_i32 = arith.constant 0 : i32
    %c0_i32_0 = arith.constant 0 : i32
    return %arg0, %c0_i32 : i32, i32
  }
  func.func @transform_14(%arg0: i32) -> (i32, i32) {
    %c0_i32 = arith.constant 0 : i32
    %c0_i32_0 = arith.constant 0 : i32
    return %arg0, %c0_i32 : i32, i32
  }
}

module attributes {stable_mosaic.version = 11 : i64} {
  func.func @ae_kernel(%arg0: i32, %arg1: memref<16x128xbf16, #tpu.memory_space<vmem>>, %arg2: memref<128x256xbf16, #tpu.memory_space<vmem>>, %arg3: memref<1x256xf32, #tpu.memory_space<vmem>>, %arg4: memref<256x128xbf16, #tpu.memory_space<vmem>>, %arg5: memref<1x128xf32, #tpu.memory_space<vmem>>, %arg6: memref<128x128xbf16, #tpu.memory_space<vmem>>, %arg7: memref<1x128xf32, #tpu.memory_space<vmem>>, %arg8: memref<128x128xbf16, #tpu.memory_space<vmem>>, %arg9: memref<1x128xf32, #tpu.memory_space<vmem>>, %arg10: memref<128x256xbf16, #tpu.memory_space<vmem>>, %arg11: memref<1x256xf32, #tpu.memory_space<vmem>>, %arg12: memref<256x128xbf16, #tpu.memory_space<vmem>>, %arg13: memref<1x128xf32, #tpu.memory_space<vmem>>, %arg14: memref<16x128xbf16, #tpu.memory_space<vmem>>, %arg15: memref<16x128xf32, #tpu.memory_space<vmem>>) attributes {dimension_semantics = [#tpu.dimension_semantics<parallel>], iteration_bounds = array<i64: 1>, scalar_prefetch = 0 : i64, scratch_operands = 0 : i64, tpu.core_type = #tpu.core_type<tc>, window_params = [{transform_indices = @transform_0, window_bounds = array<i64: 16, 128>}, {pipeline_mode = #tpu.pipeline_mode<synchronous>, transform_indices = @transform_1, window_bounds = array<i64: 128, 256>}, {pipeline_mode = #tpu.pipeline_mode<synchronous>, transform_indices = @transform_2, window_bounds = array<i64: 1, 256>}, {pipeline_mode = #tpu.pipeline_mode<synchronous>, transform_indices = @transform_3, window_bounds = array<i64: 256, 128>}, {pipeline_mode = #tpu.pipeline_mode<synchronous>, transform_indices = @transform_4, window_bounds = array<i64: 1, 128>}, {pipeline_mode = #tpu.pipeline_mode<synchronous>, transform_indices = @transform_5, window_bounds = array<i64: 128, 128>}, {pipeline_mode = #tpu.pipeline_mode<synchronous>, transform_indices = @transform_6, window_bounds = array<i64: 1, 128>}, {pipeline_mode = #tpu.pipeline_mode<synchronous>, transform_indices = @transform_7, window_bounds = array<i64: 128, 128>}, {pipeline_mode = #tpu.pipeline_mode<synchronous>, transform_indices = @transform_8, window_bounds = array<i64: 1, 128>}, {pipeline_mode = #tpu.pipeline_mode<synchronous>, transform_indices = @transform_9, window_bounds = array<i64: 128, 256>}, {pipeline_mode = #tpu.pipeline_mode<synchronous>, transform_indices = @transform_10, window_bounds = array<i64: 1, 256>}, {pipeline_mode = #tpu.pipeline_mode<synchronous>, transform_indices = @transform_11, window_bounds = array<i64: 256, 128>}, {pipeline_mode = #tpu.pipeline_mode<synchronous>, transform_indices = @transform_12, window_bounds = array<i64: 1, 128>}, {transform_indices = @transform_13, window_bounds = array<i64: 16, 128>}, {transform_indices = @transform_14, window_bounds = array<i64: 16, 128>}]} {
    %c0 = arith.constant 0 : index
    %c0_0 = arith.constant 0 : index
    %0 = vector.load %arg1[%c0, %c0_0] : memref<16x128xbf16, #tpu.memory_space<vmem>>, vector<16x128xbf16>
    %c0_1 = arith.constant 0 : index
    %c0_2 = arith.constant 0 : index
    %1 = vector.load %arg2[%c0_1, %c0_2] : memref<128x256xbf16, #tpu.memory_space<vmem>>, vector<128x256xbf16>
    %cst = arith.constant dense<0.000000e+00> : vector<16x256xf32>
    %2 = tpu.matmul %0, %1, %cst {dimension_numbers = #tpu.dot_dimension_numbers<[1], [0], [0], [1], [0, 0, 1, 1], [], []>} : vector<16x128xbf16>, vector<128x256xbf16>, vector<16x256xf32> -> vector<16x256xf32>
    %c0_3 = arith.constant 0 : index
    %c0_4 = arith.constant 0 : index
    %3 = vector.load %arg3[%c0_3, %c0_4] : memref<1x256xf32, #tpu.memory_space<vmem>>, vector<1x256xf32>
    %4 = vector.broadcast %3 : vector<1x256xf32> to vector<16x256xf32>
    %5 = arith.addf %2, %4 : vector<16x256xf32>
    %cst_5 = arith.constant 0.000000e+00 : f32
    %6 = vector.broadcast %cst_5 : f32 to vector<16x256xf32>
    %7 = arith.maximumf %5, %6 : vector<16x256xf32>
    %8 = arith.truncf %7 : vector<16x256xf32> to vector<16x256xbf16>
    %c0_6 = arith.constant 0 : index
    %c0_7 = arith.constant 0 : index
    %9 = vector.load %arg4[%c0_6, %c0_7] : memref<256x128xbf16, #tpu.memory_space<vmem>>, vector<256x128xbf16>
    %cst_8 = arith.constant dense<0.000000e+00> : vector<16x128xf32>
    %10 = tpu.matmul %8, %9, %cst_8 {dimension_numbers = #tpu.dot_dimension_numbers<[1], [0], [0], [1], [0, 0, 1, 1], [], []>} : vector<16x256xbf16>, vector<256x128xbf16>, vector<16x128xf32> -> vector<16x128xf32>
    %c0_9 = arith.constant 0 : index
    %c0_10 = arith.constant 0 : index
    %11 = vector.load %arg5[%c0_9, %c0_10] : memref<1x128xf32, #tpu.memory_space<vmem>>, vector<1x128xf32>
    %12 = vector.broadcast %11 : vector<1x128xf32> to vector<16x128xf32>
    %13 = arith.addf %10, %12 : vector<16x128xf32>
    %cst_11 = arith.constant 0.000000e+00 : f32
    %14 = vector.broadcast %cst_11 : f32 to vector<16x128xf32>
    %15 = arith.maximumf %13, %14 : vector<16x128xf32>
    %16 = arith.truncf %15 : vector<16x128xf32> to vector<16x128xbf16>
    %c0_12 = arith.constant 0 : index
    %c0_13 = arith.constant 0 : index
    %17 = vector.load %arg6[%c0_12, %c0_13] : memref<128x128xbf16, #tpu.memory_space<vmem>>, vector<128x128xbf16>
    %cst_14 = arith.constant dense<0.000000e+00> : vector<16x128xf32>
    %18 = tpu.matmul %16, %17, %cst_14 {dimension_numbers = #tpu.dot_dimension_numbers<[1], [0], [0], [1], [0, 0, 1, 1], [], []>} : vector<16x128xbf16>, vector<128x128xbf16>, vector<16x128xf32> -> vector<16x128xf32>
    %c0_15 = arith.constant 0 : index
    %c0_16 = arith.constant 0 : index
    %19 = vector.load %arg7[%c0_15, %c0_16] : memref<1x128xf32, #tpu.memory_space<vmem>>, vector<1x128xf32>
    %20 = vector.broadcast %19 : vector<1x128xf32> to vector<16x128xf32>
    %21 = arith.addf %18, %20 : vector<16x128xf32>
    %c0_17 = arith.constant 0 : index
    %c0_18 = arith.constant 0 : index
    %22 = vector.load %arg15[%c0_17, %c0_18] : memref<16x128xf32, #tpu.memory_space<vmem>>, vector<16x128xf32>
    tpu.vector_store %arg15[%c0_17, %c0_18], %21 {strides = array<i32>} : memref<16x128xf32, #tpu.memory_space<vmem>>, vector<16x128xf32>,
    %23 = arith.truncf %21 : vector<16x128xf32> to vector<16x128xbf16>
    %c0_19 = arith.constant 0 : index
    %c0_20 = arith.constant 0 : index
    %24 = vector.load %arg8[%c0_19, %c0_20] : memref<128x128xbf16, #tpu.memory_space<vmem>>, vector<128x128xbf16>
    %cst_21 = arith.constant dense<0.000000e+00> : vector<16x128xf32>
    %25 = tpu.matmul %23, %24, %cst_21 {dimension_numbers = #tpu.dot_dimension_numbers<[1], [0], [0], [1], [0, 0, 1, 1], [], []>} : vector<16x128xbf16>, vector<128x128xbf16>, vector<16x128xf32> -> vector<16x128xf32>
    %c0_22 = arith.constant 0 : index
    %c0_23 = arith.constant 0 : index
    %26 = vector.load %arg9[%c0_22, %c0_23] : memref<1x128xf32, #tpu.memory_space<vmem>>, vector<1x128xf32>
    %27 = vector.broadcast %26 : vector<1x128xf32> to vector<16x128xf32>
    %28 = arith.addf %25, %27 : vector<16x128xf32>
    %cst_24 = arith.constant 0.000000e+00 : f32
    %29 = vector.broadcast %cst_24 : f32 to vector<16x128xf32>
    %30 = arith.maximumf %28, %29 : vector<16x128xf32>
    %31 = arith.truncf %30 : vector<16x128xf32> to vector<16x128xbf16>
    %c0_25 = arith.constant 0 : index
    %c0_26 = arith.constant 0 : index
    %32 = vector.load %arg10[%c0_25, %c0_26] : memref<128x256xbf16, #tpu.memory_space<vmem>>, vector<128x256xbf16>
    %cst_27 = arith.constant dense<0.000000e+00> : vector<16x256xf32>
    %33 = tpu.matmul %31, %32, %cst_27 {dimension_numbers = #tpu.dot_dimension_numbers<[1], [0], [0], [1], [0, 0, 1, 1], [], []>} : vector<16x128xbf16>, vector<128x256xbf16>, vector<16x256xf32> -> vector<16x256xf32>
    %c0_28 = arith.constant 0 : index
    %c0_29 = arith.constant 0 : index
    %34 = vector.load %arg11[%c0_28, %c0_29] : memref<1x256xf32, #tpu.memory_space<vmem>>, vector<1x256xf32>
    %35 = vector.broadcast %34 : vector<1x256xf32> to vector<16x256xf32>
    %36 = arith.addf %33, %35 : vector<16x256xf32>
    %cst_30 = arith.constant 0.000000e+00 : f32
    %37 = vector.broadcast %cst_30 : f32 to vector<16x256xf32>
    %38 = arith.maximumf %36, %37 : vector<16x256xf32>
    %39 = arith.truncf %38 : vector<16x256xf32> to vector<16x256xbf16>
    %c0_31 = arith.constant 0 : index
    %c0_32 = arith.constant 0 : index
    %40 = vector.load %arg12[%c0_31, %c0_32] : memref<256x128xbf16, #tpu.memory_space<vmem>>, vector<256x128xbf16>
    %cst_33 = arith.constant dense<0.000000e+00> : vector<16x128xf32>
    %41 = tpu.matmul %39, %40, %cst_33 {dimension_numbers = #tpu.dot_dimension_numbers<[1], [0], [0], [1], [0, 0, 1, 1], [], []>} : vector<16x256xbf16>, vector<256x128xbf16>, vector<16x128xf32> -> vector<16x128xf32>
    %c0_34 = arith.constant 0 : index
    %c0_35 = arith.constant 0 : index
    %42 = vector.load %arg13[%c0_34, %c0_35] : memref<1x128xf32, #tpu.memory_space<vmem>>, vector<1x128xf32>
    %43 = vector.broadcast %42 : vector<1x128xf32> to vector<16x128xf32>
    %44 = arith.addf %41, %43 : vector<16x128xf32>
    %45 = arith.truncf %44 : vector<16x128xf32> to vector<16x128xbf16>
    %c0_36 = arith.constant 0 : index
    %c0_37 = arith.constant 0 : index
    %46 = vector.load %arg14[%c0_36, %c0_37] : memref<16x128xbf16, #tpu.memory_space<vmem>>, vector<16x128xbf16>
    tpu.vector_store %arg14[%c0_36, %c0_37], %45 {strides = array<i32>} : memref<16x128xbf16, #tpu.memory_space<vmem>>, vector<16x128xbf16>,
    return
  }
  func.func @transform_0(%arg0: i32) -> (i32, i32) {
    %c0_i32 = arith.constant 0 : i32
    %c0_i32_0 = arith.constant 0 : i32
    return %arg0, %c0_i32 : i32, i32
  }
  func.func @transform_1(%arg0: i32) -> (i32, i32) {
    %c0_i32 = arith.constant 0 : i32
    %c0_i32_0 = arith.constant 0 : i32
    %c0_i32_1 = arith.constant 0 : i32
    return %c0_i32, %c0_i32_0 : i32, i32
  }
  func.func @transform_2(%arg0: i32) -> (i32, i32) {
    %c0_i32 = arith.constant 0 : i32
    %c0_i32_0 = arith.constant 0 : i32
    %c0_i32_1 = arith.constant 0 : i32
    return %c0_i32, %c0_i32_0 : i32, i32
  }
  func.func @transform_3(%arg0: i32) -> (i32, i32) {
    %c0_i32 = arith.constant 0 : i32
    %c0_i32_0 = arith.constant 0 : i32
    %c0_i32_1 = arith.constant 0 : i32
    return %c0_i32, %c0_i32_0 : i32, i32
  }
  func.func @transform_4(%arg0: i32) -> (i32, i32) {
    %c0_i32 = arith.constant 0 : i32
    %c0_i32_0 = arith.constant 0 : i32
    %c0_i32_1 = arith.constant 0 : i32
    return %c0_i32, %c0_i32_0 : i32, i32
  }
  func.func @transform_5(%arg0: i32) -> (i32, i32) {
    %c0_i32 = arith.constant 0 : i32
    %c0_i32_0 = arith.constant 0 : i32
    %c0_i32_1 = arith.constant 0 : i32
    return %c0_i32, %c0_i32_0 : i32, i32
  }
  func.func @transform_6(%arg0: i32) -> (i32, i32) {
    %c0_i32 = arith.constant 0 : i32
    %c0_i32_0 = arith.constant 0 : i32
    %c0_i32_1 = arith.constant 0 : i32
    return %c0_i32, %c0_i32_0 : i32, i32
  }
  func.func @transform_7(%arg0: i32) -> (i32, i32) {
    %c0_i32 = arith.constant 0 : i32
    %c0_i32_0 = arith.constant 0 : i32
    %c0_i32_1 = arith.constant 0 : i32
    return %c0_i32, %c0_i32_0 : i32, i32
  }
  func.func @transform_8(%arg0: i32) -> (i32, i32) {
    %c0_i32 = arith.constant 0 : i32
    %c0_i32_0 = arith.constant 0 : i32
    %c0_i32_1 = arith.constant 0 : i32
    return %c0_i32, %c0_i32_0 : i32, i32
  }
  func.func @transform_9(%arg0: i32) -> (i32, i32) {
    %c0_i32 = arith.constant 0 : i32
    %c0_i32_0 = arith.constant 0 : i32
    %c0_i32_1 = arith.constant 0 : i32
    return %c0_i32, %c0_i32_0 : i32, i32
  }
  func.func @transform_10(%arg0: i32) -> (i32, i32) {
    %c0_i32 = arith.constant 0 : i32
    %c0_i32_0 = arith.constant 0 : i32
    %c0_i32_1 = arith.constant 0 : i32
    return %c0_i32, %c0_i32_0 : i32, i32
  }
  func.func @transform_11(%arg0: i32) -> (i32, i32) {
    %c0_i32 = arith.constant 0 : i32
    %c0_i32_0 = arith.constant 0 : i32
    %c0_i32_1 = arith.constant 0 : i32
    return %c0_i32, %c0_i32_0 : i32, i32
  }
  func.func @transform_12(%arg0: i32) -> (i32, i32) {
    %c0_i32 = arith.constant 0 : i32
    %c0_i32_0 = arith.constant 0 : i32
    %c0_i32_1 = arith.constant 0 : i32
    return %c0_i32, %c0_i32_0 : i32, i32
  }
  func.func @transform_13(%arg0: i32) -> (i32, i32) {
    %c0_i32 = arith.constant 0 : i32
    %c0_i32_0 = arith.constant 0 : i32
    return %arg0, %c0_i32 : i32, i32
  }
  func.func @transform_14(%arg0: i32) -> (i32, i32) {
    %c0_i32 = arith.constant 0 : i32
    %c0_i32_0 = arith.constant 0 : i32
    return %arg0, %c0_i32 : i32, i32
  }
}

</mosaic_0001>

<bundles_post_ra>
// kernel: tpu_custom_call.1
= control target key start
LH: loop header
LB: loop body
LE: loop exit
PB: predicated region body
PF: predicated region fallthrough
CT: control target
= control target key end

     0   :  { %20 = vsyncpa [#allocation3], 0  ;;  %s1892_s0 = inlined_call_operand.hbm [shape: bf16[16,128], index: 0, kind: input, shape index: {}]   ;;  %s1893_s1 = inlined_call_operand.hbm [shape: bf16[128,256], index: 1, kind: input, shape index: {}]   ;;  %s1894_s2 = inlined_call_operand.vmem [shape: f32[1,256], index: 2, kind: input, shape index: {}]   ;;  %s1895_s3 = inlined_call_operand.hbm [shape: bf16[256,128], index: 3, kind: input, shape index: {}]   ;;  %s1896_s4 = inlined_call_operand.vmem [shape: f32[1,128], index: 4, kind: input, shape index: {}]   ;;  %s1897_s5 = inlined_call_operand.hbm [shape: bf16[128,128], index: 5, kind: input, shape index: {}]   ;;  %s1898_s6 = inlined_call_operand.vmem [shape: f32[1,128], index: 6, kind: input, shape index: {}]   ;;  %s1899_s7 = inlined_call_operand.hbm [shape: bf16[128,128], index: 7, kind: input, shape index: {}]   ;;  %s1900_s8 = inlined_call_operand.vmem [shape: f32[1,128], index: 8, kind: input, shape index: {}]   ;;  %s1901_s9 = inlined_call_operand.hbm [shape: bf16[128,256], index: 9, kind: input, shape index: {}]   ;;  %s1902_s10 = inlined_call_operand.vmem [shape: f32[1,256], index: 10, kind: input, shape index: {}]   ;;  %s1903_s11 = inlined_call_operand.hbm [shape: bf16[256,128], index: 11, kind: input, shape index: {}]   ;;  %s1904_s12 = inlined_call_operand.vmem [shape: f32[1,128], index: 12, kind: input, shape index: {}]   ;;  %s1905_s13 = inlined_call_operand.hbm [shape: bf16[16,128], index: 13, kind: output, shape index: {0}]   ;;  %s1906_s14 = inlined_call_operand.hbm [shape: f32[16,128], index: 14, kind: output, shape index: {1}]  }
   0x1   :  { %21 = vsyncpa [#allocation6], 0 }
   0x2   :  { %22 = vsyncpa [#allocation9], 0 }
   0x3   :  { %23 = vsyncpa [#allocation12], 0 }
   0x4   :  { %24 = vsyncpa [#allocation4], 0 }
   0x5   :  { %25 = vsyncpa [#allocation16], 0  ;;  %s1616_s29 = smov [#allocation5]   ;;  %s1406_s17 = scalar_lea.hbm %s1893_s1, 2048 }
   0x6   :  { %s43_s30 = sshll.u32 %s1616_s29, 4  ;;  %p1407_p0 = scmp.ne.s32.totalorder %s1893_s1, %s1406_s17  ;;  %s44_s30 = int_to_ptr.vmem [resolvable:$true] %s43_s30 }
   0x7   :  { %p1410_p1 = scmp.lt.u32.totalorder %s1406_s17, %s1893_s1 }
   0x9   :  { %p1412_p2 = pnand %p1410_p1, %p1407_p0 }
   0xb   :  { %1415 = shalt.err (!%p1412_p2)
}
   0xc   :  { %s1416_s22 = scalar_lea.vmem %s44_s30, 2048  ;;  %p1421_p4 = scmp.lt.s32.totalorder %s44_s30, %s44_s30 }
   0xd   :  { %p1417_p3 = scmp.ne.s32.totalorder %s44_s30, %s1416_s22  ;;  %p1422_p5 = scmp.lt.s32.totalorder %s1416_s22, %s1416_s22 }
   0xf   :  { %p1423_p6 = por %p1422_p5, %p1421_p4 }
  0x11   :  { %p1424_p7 = pnand %p1423_p6, %p1417_p3 }
  0x13   :  { %1427 = shalt.err (!%p1424_p7)
}
  0x14   :  { %s1617_s23 = smov 128   ;;  %s1618_s24 = smov 8  }
  0x15   :  { %49 = dma.hbm_to_vmem [thread:$0]  %s1893_s1, 2048, %s44_s30, [#allocation6], %s1617_s23, %s1617_s23, %s1618_s24  }
  0x16   :  { %s1619_s27 = smov [#allocation8]   ;;  %s1620_s29 = smov [#allocation11]  }
  0x17   :  { %s71_s28 = sshll.u32 %s1619_s27, 4  ;;  %s99_s15 = sshll.u32 %s1620_s29, 4  ;;  %s72_s28 = int_to_ptr.vmem [resolvable:$true] %s71_s28  ;;  %s100_s15 = int_to_ptr.vmem [resolvable:$true] %s99_s15 }
  0x18   :  { %s1428_s18 = scalar_lea.hbm %s1897_s5, 1024 }
  0x19   :  { %p1429_p8 = scmp.ne.s32.totalorder %s1897_s5, %s1428_s18  ;;  %p1432_p9 = scmp.lt.u32.totalorder %s1428_s18, %s1897_s5 }
  0x1b   :  { %p1434_p10 = pnand %p1432_p9, %p1429_p8 }
  0x1d   :  { %1437 = shalt.err (!%p1434_p10)
}
  0x1e   :  { %s1438_s1 = scalar_lea.vmem %s72_s28, 1024  ;;  %p1443_p12 = scmp.lt.s32.totalorder %s72_s28, %s72_s28 }
  0x1f   :  { %p1439_p11 = scmp.ne.s32.totalorder %s72_s28, %s1438_s1  ;;  %p1444_p13 = scmp.lt.s32.totalorder %s1438_s1, %s1438_s1 }
  0x21   :  { %p1445_p0 = por %p1444_p13, %p1443_p12 }
  0x23   :  { %p1446_p1 = pnand %p1445_p0, %p1439_p11 }
  0x25   :  { %1449 = shalt.err (!%p1446_p1)
}
  0x26   :  { %s1621_s30 = smov 64   ;;  %s1622_s25 = smov 4  }
  0x27   :  { %77 = dma.hbm_to_vmem [thread:$0]  %s1897_s5, 1024, %s72_s28, [#allocation9], %s1621_s30, %s1621_s30, %s1622_s25  }
  0x28   :  { %s1450_s17 = scalar_lea.hbm %s1901_s9, 2048 }
  0x29   :  { %p1451_p2 = scmp.ne.s32.totalorder %s1901_s9, %s1450_s17  ;;  %p1454_p3 = scmp.lt.u32.totalorder %s1450_s17, %s1901_s9 }
  0x2b   :  { %p1456_p4 = pnand %p1454_p3, %p1451_p2 }
  0x2d   :  { %1459 = shalt.err (!%p1456_p4)
}
  0x2e   :  { %s1460_s22 = scalar_lea.vmem %s100_s15, 2048  ;;  %p1465_p6 = scmp.lt.s32.totalorder %s100_s15, %s100_s15 }
  0x2f   :  { %p1461_p5 = scmp.ne.s32.totalorder %s100_s15, %s1460_s22  ;;  %p1466_p7 = scmp.lt.s32.totalorder %s1460_s22, %s1460_s22 }
  0x31   :  { %p1467_p8 = por %p1466_p7, %p1465_p6 }
  0x33   :  { %p1468_p9 = pnand %p1467_p8, %p1461_p5 }
  0x35   :  { %1471 = shalt.err (!%p1468_p9)
}
  0x36   :  { %105 = dma.hbm_to_vmem [thread:$0]  %s1901_s9, 2048, %s100_s15, [#allocation12], %s1617_s23, %s1617_s23, %s1618_s24  }
  0x37   :  { %s1623_s1 = smov [#allocation2]   ;;  %s1624_s27 = smov [#allocation7]  }
  0x38   :  { %s31_s26 = sshll.u32 %s1623_s1, 4  ;;  %s57_s29 = sshll.u32 %s1624_s27, 4  ;;  %s32_s26 = int_to_ptr.vmem [resolvable:$true] %s31_s26  ;;  %s58_s29 = int_to_ptr.vmem [resolvable:$true] %s57_s29 }
  0x39   :  { %s1472_s18 = scalar_lea.hbm %s1892_s0, 128 }
  0x3a   :  { %p1473_p10 = scmp.ne.s32.totalorder %s1892_s0, %s1472_s18  ;;  %p1476_p11 = scmp.lt.u32.totalorder %s1472_s18, %s1892_s0 }
  0x3c   :  { %p1478_p12 = pnand %p1476_p11, %p1473_p10 }
  0x3e   :  { %1481 = shalt.err (!%p1478_p12)
}
  0x3f   :  { %s1482_s9 = scalar_lea.vmem %s32_s26, 128  ;;  %p1487_p0 = scmp.lt.s32.totalorder %s32_s26, %s32_s26 }
  0x40   :  { %p1483_p13 = scmp.ne.s32.totalorder %s32_s26, %s1482_s9  ;;  %p1488_p1 = scmp.lt.s32.totalorder %s1482_s9, %s1482_s9 }
  0x42   :  { %p1489_p2 = por %p1488_p1, %p1487_p0 }
  0x44   :  { %p1490_p3 = pnand %p1489_p2, %p1483_p13 }
  0x46   :  { %1493 = shalt.err (!%p1490_p3)
}
  0x47   :  { %37 = dma.hbm_to_vmem [thread:$0]  %s1892_s0, 128, %s32_s26, [#allocation3], %s1621_s30, %s1621_s30, %s1622_s25  }
  0x48   :  { %s1494_s27 = scalar_lea.hbm %s1895_s3, 2048 }
  0x49   :  { %p1495_p4 = scmp.ne.s32.totalorder %s1895_s3, %s1494_s27  ;;  %p1498_p5 = scmp.lt.u32.totalorder %s1494_s27, %s1895_s3 }
  0x4b   :  { %p1500_p6 = pnand %p1498_p5, %p1495_p4 }
  0x4d   :  { %1503 = shalt.err (!%p1500_p6)
}
  0x4e   :  { %s1504_s20 = scalar_lea.vmem %s58_s29, 2048  ;;  %p1509_p8 = scmp.lt.s32.totalorder %s58_s29, %s58_s29 }
  0x4f   :  { %p1505_p7 = scmp.ne.s32.totalorder %s58_s29, %s1504_s20  ;;  %p1510_p9 = scmp.lt.s32.totalorder %s1504_s20, %s1504_s20 }
  0x51   :  { %p1511_p10 = por %p1510_p9, %p1509_p8 }
  0x53   :  { %p1512_p11 = pnand %p1511_p10, %p1505_p7 }
  0x55   :  { %1515 = shalt.err (!%p1512_p11)
}
  0x56   :  { %63 = dma.hbm_to_vmem [thread:$0]  %s1895_s3, 2048, %s58_s29, [#allocation6], %s1621_s30, %s1621_s30, %s1622_s25  }
  0x57   :  { %s1625_s21 = smov [#allocation10]   ;;  %s1626_s9 = smov [#allocation13]  }
  0x58   :  { %s85_s22 = sshll.u32 %s1625_s21, 4  ;;  %s113_s15 = sshll.u32 %s1626_s9, 4  ;;  %s86_s22 = int_to_ptr.vmem [resolvable:$true] %s85_s22  ;;  %s114_s15 = int_to_ptr.vmem [resolvable:$true] %s113_s15 }
  0x59   :  { %s1516_s1 = scalar_lea.hbm %s1899_s7, 1024 }
  0x5a   :  { %p1517_p12 = scmp.ne.s32.totalorder %s1899_s7, %s1516_s1  ;;  %p1520_p13 = scmp.lt.u32.totalorder %s1516_s1, %s1899_s7 }
  0x5c   :  { %p1522_p0 = pnand %p1520_p13, %p1517_p12 }
  0x5e   :  { %1525 = shalt.err (!%p1522_p0)
}
  0x5f   :  { %s1526_s3 = scalar_lea.vmem %s86_s22, 1024  ;;  %p1531_p2 = scmp.lt.s32.totalorder %s86_s22, %s86_s22 }
  0x60   :  { %p1527_p1 = scmp.ne.s32.totalorder %s86_s22, %s1526_s3  ;;  %p1532_p3 = scmp.lt.s32.totalorder %s1526_s3, %s1526_s3 }
  0x62   :  { %p1533_p4 = por %p1532_p3, %p1531_p2 }
  0x64   :  { %p1534_p5 = pnand %p1533_p4, %p1527_p1 }
  0x66   :  { %1537 = shalt.err (!%p1534_p5)
}
  0x67   :  { %91 = dma.hbm_to_vmem [thread:$0]  %s1899_s7, 1024, %s86_s22, [#allocation9], %s1621_s30, %s1621_s30, %s1622_s25  }
  0x68   :  { %s1538_s26 = scalar_lea.hbm %s1903_s11, 2048 }
  0x69   :  { %p1539_p6 = scmp.ne.s32.totalorder %s1903_s11, %s1538_s26  ;;  %p1542_p7 = scmp.lt.u32.totalorder %s1538_s26, %s1903_s11 }
  0x6b   :  { %p1544_p8 = pnand %p1542_p7, %p1539_p6 }
  0x6d   :  { %1547 = shalt.err (!%p1544_p8)
}
  0x6e   :  { %s1548_s1 = scalar_lea.vmem %s114_s15, 2048  ;;  %p1553_p10 = scmp.lt.s32.totalorder %s114_s15, %s114_s15 }
  0x6f   :  { %p1549_p9 = scmp.ne.s32.totalorder %s114_s15, %s1548_s1  ;;  %p1554_p11 = scmp.lt.s32.totalorder %s1548_s1, %s1548_s1 }
  0x71   :  { %p1555_p12 = por %p1554_p11, %p1553_p10 }
  0x73   :  { %p1556_p13 = pnand %p1555_p12, %p1549_p9 }
  0x75   :  { %1559 = shalt.err (!%p1556_p13)
}
  0x76   :  { %119 = dma.hbm_to_vmem [thread:$0]  %s1903_s11, 2048, %s114_s15, [#allocation12], %s1621_s30, %s1621_s30, %s1622_s25  }
  0x77   :  { %1604 = dma.done.wait [#allocation3], 128  }
  0x78   :  { %1605 = vsyncadd [#allocation3], 4294967168 }
  0x79   :  { %1606 = dma.done.wait [#allocation6], 4096  }
  0x7a   :  { %1607 = vsyncadd [#allocation6], 4294963200 }
  0x7b   :  { %1608 = dma.done.wait [#allocation9], 2048  }
  0x7c   :  { %1609 = vsyncadd [#allocation9], 4294965248 }
  0x7d   :  { %1610 = dma.done.wait [#allocation12], 4096  }
  0x7e   :  { %1611 = vsyncadd [#allocation12], 4294963200  ;;  %v1627_v0 = vmov 0   ;;  %v1309_v1 = vld [vmem:[#allocation5 + $0x4] ss:$8 sps:$4 sm:$0xff]   ;;  %v1338_v16 = vld [vmem:[#allocation7 + $0x50] sm:$0xff]   ;;  %v164_v40 = vlaneseq }
  0x7f   :  { %292 = vmatprep.mubr.bf16.mxu0 %v1627_v0  ;;  %v1311_v2 = vld [vmem:[#allocation5] ss:$8 sps:$4 sm:$0xff]   ;;  %260 = vmatprep.subr.bf16.mxu0 %v1309_v1  ;;  %v1312_v3 = vld [vmem:[#allocation5 + $0x14] ss:$8 sps:$4 sm:$0xff]   ;;  %v1314_v4 = vld [vmem:[#allocation5 + $0x10] ss:$8 sps:$4 sm:$0xff]  }
  0x80   :  { %261 = vmatpush1.bf16.msra.mxu0 %v1311_v2  ;;  %v1315_v5 = vld [vmem:[#allocation5 + $0x24] ss:$8 sps:$4 sm:$0xff]   ;;  %v1317_v6 = vld [vmem:[#allocation5 + $0x20] ss:$8 sps:$4 sm:$0xff]   ;;  %v1318_v7 = vld [vmem:[#allocation5 + $0x34] ss:$8 sps:$4 sm:$0xff]  }
  0x81   :  { %262 = vmatprep.subr.bf16.mxu0 %v1312_v3  ;;  %v1320_v8 = vld [vmem:[#allocation5 + $0x30] ss:$8 sps:$4 sm:$0xff]   ;;  %v1321_v9 = vld [vmem:[#allocation5 + $0x44] ss:$8 sps:$4 sm:$0xff]   ;;  %v1323_v11 = vld [vmem:[#allocation5 + $0x40] ss:$8 sps:$4 sm:$0xff]  }
  0x82   :  { %v1334_v10 = vld [vmem:[#allocation7 + $0x40] sm:$0xff]   ;;  %v1324_v13 = vld [vmem:[#allocation5 + $0x54] ss:$8 sps:$4 sm:$0xff]   ;;  %v1336_v14 = vld [vmem:[#allocation7 + $0x48] sm:$0xff]   ;;  %v1628_v35 = vmov 0.0   ;;  %v1820_v41 = vshrl.u32 %v164_v40, 7 }
  0x83   :  { %v1335_v12 = vld [vmem:[#allocation7] sm:$0xff]   ;;  %1191 = vmatprep.subr.bf16.mxu1 %v1334_v10  ;;  %v1337_v15 = vld [vmem:[#allocation7 + $0x8] sm:$0xff]   ;;  %v1326_v17 = vld [vmem:[#allocation5 + $0x50] ss:$8 sps:$4 sm:$0xff]   ;;  %vm1629_vm0 = vmmov 0  }
  0x84   :  { %263 = vmatpush1.bf16.msra.mxu0 %v1314_v4  ;;  %1192 = vmatpush3.bf16.msra.mxu1 %v1335_v12  ;;  %v1327_v18 = vld [vmem:[#allocation5 + $0x64] ss:$8 sps:$4 sm:$0xff]   ;;  %v1339_v19 = vld [vmem:[#allocation7 + $0x10] sm:$0xff]   ;;  %v1340_v20 = vld [vmem:[#allocation7 + $0x58] sm:$0xff]   ;;  %v166_v42 = vsub.s32 0, %v1820_v41  ;;  %v170_v44 = vsub.s32 1, %v1820_v41 }
  0x85   :  { %264 = vmatprep.subr.bf16.mxu0 %v1315_v5  ;;  %1193 = vmatprep.subr.bf16.mxu1 %v1336_v14  ;;  %v1329_v21 = vld [vmem:[#allocation5 + $0x60] ss:$8 sps:$4 sm:$0xff]   ;;  %v1330_v22 = vld [vmem:[#allocation5 + $0x74] ss:$8 sps:$4 sm:$0xff]   ;;  %v1332_v25 = vld [vmem:[#allocation5 + $0x70] ss:$8 sps:$4 sm:$0xff]  }
  0x86   :  { %v1341_v23 = vld [vmem:[#allocation7 + $0x18] sm:$0xff]   ;;  %v1342_v24 = vld [vmem:[#allocation7 + $0x60] sm:$0xff]   ;;  %v1344_v27 = vld [vmem:[#allocation7 + $0x68] sm:$0xff]  }
  0x87   :  { %v1343_v26 = vld [vmem:[#allocation7 + $0x20] sm:$0xff]   ;;  %v1333_v28 = vld [vmem:[#allocation2] sm:$0xff]   ;;  %v1345_v29 = vld [vmem:[#allocation7 + $0x28] sm:$0xff]  }
  0x88   :  { %265 = vmatpush1.bf16.msra.mxu0 %v1317_v6  ;;  %1194 = vmatpush3.bf16.msra.mxu1 %v1337_v15  ;;  %v1346_v30 = vld [vmem:[#allocation7 + $0x70] sm:$0xff]   ;;  %v1348_v32 = vld [vmem:[#allocation7 + $0x78] sm:$0xff]   ;;  %v1350_v34 = vld [vmem:[#allocation8] sm:$0xff]  }
  0x89   :  { %266 = vmatprep.subr.bf16.mxu0 %v1318_v7  ;;  %1195 = vmatprep.subr.bf16.mxu1 %v1338_v16  ;;  %v1347_v31 = vld [vmem:[#allocation7 + $0x30] sm:$0xff]   ;;  %v1349_v33 = vld [vmem:[#allocation7 + $0x38] sm:$0xff]   ;;  %v1351_v36 = vld [vmem:[#allocation8 + $0x8] sm:$0xff]  }
  0x8a   :  { %v1352_v37 = vld [vmem:[#allocation8 + $0x10] sm:$0xff]   ;;  %v1353_v38 = vld [vmem:[#allocation8 + $0x18] sm:$0xff]   ;;  %v1354_v39 = vld [vmem:[#allocation8 + $0x20] sm:$0xff]  }
  0x8b   :  { %v162_v43 = vld [vmem:[%s1894_s2] sm:$0x3]  ;;  %v1355_v61 = vld [vmem:[#allocation8 + $0x28] sm:$0xff]   ;;  %v1356_v62 = vld [vmem:[#allocation8 + $0x30] sm:$0xff]  }
  0x8c   :  { %267 = vmatpush1.bf16.msra.mxu0 %v1320_v8  ;;  %1196 = vmatpush3.bf16.msra.mxu1 %v1339_v19  ;;  %v167_v45 = vrot.slane %v162_v43, %v166_v42  ;;  %v171_v46 = vrot.slane %v162_v43, %v170_v44  ;;  %v1357_v63 = vld [vmem:[#allocation8 + $0x38] sm:$0xff]   ;;  %v1358_v1 = vld [vmem:[#allocation10] sm:$0xff]   ;;  %v1359_v2 = vld [vmem:[#allocation10 + $0x8] sm:$0xff]  }
  0x8d   :  { %268 = vmatprep.subr.bf16.mxu0 %v1321_v9  ;;  %1197 = vmatprep.subr.bf16.mxu1 %v1340_v20  ;;  %v1360_v3 = vld [vmem:[#allocation10 + $0x10] sm:$0xff]   ;;  %v1361_v4 = vld [vmem:[#allocation10 + $0x18] sm:$0xff]   ;;  %v1362_v5 = vld [vmem:[#allocation10 + $0x20] sm:$0xff]  }
  0x8e   :  { %v1363_v6 = vld [vmem:[#allocation10 + $0x28] sm:$0xff]   ;;  %v1114_v8 = vld [vmem:[%s1896_s4] ss:$0 sm:$0xff]  ;;  %v1364_v19 = vld [vmem:[#allocation10 + $0x30] sm:$0xff]  }
  0x8f   :  { %v1365_v20 = vld [vmem:[#allocation10 + $0x38] sm:$0xff]   ;;  %v1386_v40 = vld [vmem:[#allocation11 + $0x64] ss:$8 sps:$4 sm:$0xff]   ;;  %v1384_v43 = vld [vmem:[#allocation11 + $0x60] ss:$8 sps:$4 sm:$0xff]  }
  0x90   :  { %269 = vmatpush1.bf16.msra.mxu0 %v1323_v11  ;;  %1198 = vmatpush3.bf16.msra.mxu1 %v1341_v23  ;;  %v1371_v23 = vld [vmem:[#allocation11 + $0x14] ss:$8 sps:$4 sm:$0xff]  }
  0x91   :  { %270 = vmatprep.subr.bf16.mxu0 %v1324_v13  ;;  %1199 = vmatprep.subr.bf16.mxu1 %v1342_v24  ;;  %v1369_v24 = vld [vmem:[#allocation11 + $0x10] ss:$8 sps:$4 sm:$0xff]  }
  0x94   :  { %271 = vmatpush1.bf16.msra.mxu0 %v1326_v17  ;;  %1200 = vmatpush3.bf16.msra.mxu1 %v1343_v26  ;;  %v1372_v26 = vld [vmem:[#allocation11 + $0x20] ss:$8 sps:$4 sm:$0xff]  }
  0x95   :  { %272 = vmatprep.subr.bf16.mxu0 %v1327_v18  ;;  %1201 = vmatprep.subr.bf16.mxu1 %v1344_v27  ;;  %v1377_v27 = vld [vmem:[#allocation11 + $0x34] ss:$8 sps:$4 sm:$0xff]  }
  0x98   :  { %273 = vmatpush1.bf16.msra.mxu0 %v1329_v21  ;;  %1202 = vmatpush3.bf16.msra.mxu1 %v1345_v29  ;;  %v1366_v21 = vld [vmem:[#allocation11] ss:$8 sps:$4 sm:$0xff]  }
  0x99   :  { %274 = vmatprep.subr.bf16.mxu0 %v1330_v22  ;;  %1203 = vmatprep.subr.bf16.mxu1 %v1346_v30  ;;  %v1368_v22 = vld [vmem:[#allocation11 + $0x4] ss:$8 sps:$4 sm:$0xff]   ;;  %v1378_v29 = vld [vmem:[#allocation11 + $0x40] ss:$8 sps:$4 sm:$0xff]   ;;  %v1383_v30 = vld [vmem:[#allocation11 + $0x54] ss:$8 sps:$4 sm:$0xff]  }
  0x9c   :  { %275 = vmatpush1.bf16.msra.mxu0 %v1332_v25  ;;  %1204 = vmatpush3.bf16.msra.mxu1 %v1347_v31  ;;  %v1374_v25 = vld [vmem:[#allocation11 + $0x24] ss:$8 sps:$4 sm:$0xff]   ;;  %v1381_v31 = vld [vmem:[#allocation11 + $0x50] ss:$8 sps:$4 sm:$0xff]  }
  0x9d   :  { %1205 = vmatprep.subr.bf16.mxu1 %v1348_v32  ;;  %1253 = vmatprep.subr.bf16.mxu0 %v1628_v35  ;;  %v1131_v32 = vld [vmem:[%s1898_s6] ss:$0 sm:$0xff] }
  0x9f   :  { %293 = vmatmul.mubr.bf16.vlgmr.msra.gmra.mrb[0].mxu0 %v1333_v28  ;;  %v1380_v28 = vld [vmem:[#allocation11 + $0x44] ss:$8 sps:$4 sm:$0xff]  }
  0xa0   :  { %1206 = vmatpush3.bf16.msra.mxu1 %v1349_v33  ;;  %1254 = vmatpush3.bf16.msra.mxu0 %v1350_v34 }
  0xa1   :  { %1273 = vmatprep.subr.bf16.mxu1 %v1628_v35  ;;  %1255 = vmatprep.subr.bf16.mxu0 %v1628_v35 }
  0xa2   :  { %1269 = vmatprep.mubr.msk.bf16.mxu0 %vm1629_vm0, %v1628_v35 }
  0xa4   :  { %1256 = vmatpush3.bf16.msra.mxu0 %v1351_v36 }
  0xa5   :  { %1257 = vmatprep.subr.bf16.mxu0 %v1628_v35 }
  0xa8   :  { %1258 = vmatpush3.bf16.msra.mxu0 %v1352_v37 }
  0xa9   :  { %1259 = vmatprep.subr.bf16.mxu0 %v1628_v35 }
  0xac   :  { %1260 = vmatpush3.bf16.msra.mxu0 %v1353_v38 }
  0xad   :  { %1261 = vmatprep.subr.bf16.mxu0 %v1628_v35 }
  0xb0   :  { %1262 = vmatpush3.bf16.msra.mxu0 %v1354_v39 }
  0xb1   :  { %1263 = vmatprep.subr.bf16.mxu0 %v1628_v35 }
  0xb4   :  { %1264 = vmatpush3.bf16.msra.mxu0 %v1355_v61 }
  0xb5   :  { %1265 = vmatprep.subr.bf16.mxu0 %v1628_v35 }
  0xb8   :  { %1266 = vmatpush3.bf16.msra.mxu0 %v1356_v62 }
  0xb9   :  { %1267 = vmatprep.subr.bf16.mxu0 %v1628_v35 }
  0xbc   :  { %1268 = vmatpush3.bf16.msra.mxu0 %v1357_v63 }
  0xbd   :  { %826 = vmatprep.subr.bf16.mxu0 %v1368_v22 }
 0x172   :  { %v294_v47 = vpop.f32.mrb[0].mxu0 }
 0x173   :  { %v295_v48 = vadd.f32 %v294_v47, %v167_v45  ;;  %v296_v49 = vpop.f32.mrb[1].mxu0  ;;  %v1390_v47 = vld [vmem:[#allocation13 + $0x40] sm:$0xff]  }
 0x174   :  { %v297_v50 = vadd.f32 %v296_v49, %v171_v46  ;;  %v298_v51 = vpop.f32.mrb[2].mxu0  ;;  %v1392_v49 = vld [vmem:[#allocation13 + $0x48] sm:$0xff]  }
 0x175   :  { %v299_v52 = vadd.f32 %v298_v51, %v167_v45  ;;  %v300_v53 = vpop.f32.mrb[3].mxu0  ;;  %v303_v55 = vmax.f32 %v295_v48, 0.0  ;;  %v1389_v45 = vld [vmem:[#allocation11 + $0x74] ss:$8 sps:$4 sm:$0xff]   ;;  %v1391_v48 = vld [vmem:[#allocation13] sm:$0xff]  }
 0x176   :  { %v301_v54 = vadd.f32 %v300_v53, %v171_v46  ;;  %v304_v57 = vmax.f32 %v297_v50, 0.0  ;;  %v1387_v46 = vld [vmem:[#allocation11 + $0x70] ss:$8 sps:$4 sm:$0xff]   ;;  %v1393_v50 = vld [vmem:[#allocation13 + $0x8] sm:$0xff]  }
 0x177   :  { %v305_v56 = vmax.f32 %v299_v52, 0.0  ;;  %v1394_v51 = vld [vmem:[#allocation13 + $0x50] sm:$0xff]   ;;  %v1396_v53 = vld [vmem:[#allocation13 + $0x58] sm:$0xff]  }
 0x178   :  { %v306_v58 = vmax.f32 %v301_v54, 0.0  ;;  %v1395_v52 = vld [vmem:[#allocation13 + $0x10] sm:$0xff]   ;;  %v1397_v54 = vld [vmem:[#allocation13 + $0x18] sm:$0xff]  }
 0x179   :  { %v307_v59 = vpack.c.bf16 %v305_v56, %v303_v55  ;;  %v1398_v55 = vld [vmem:[#allocation13 + $0x60] sm:$0xff]  }
 0x17a   :  { %v308_v60 = vpack.c.bf16 %v306_v58, %v304_v57  ;;  %v1399_v56 = vld [vmem:[#allocation13 + $0x20] sm:$0xff]   ;;  %v1400_v57 = vld [vmem:[#allocation13 + $0x68] sm:$0xff]   ;;  %v1140_v58 = vld [vmem:[%s1900_s8] ss:$0 sm:$0xff] }
 0x17c   :  { %476 = vmatprep.mubr.bf16.mxu1 %v308_v60 }
 0x17d   :  { %477 = vmatmul.mubr.bf16.vlgmr.msra.gmra.mrb[0].mxu1 %v307_v59 }
 0x17e   :  { %1289 = vmatprep.mubr.msk.bf16.mxu1 %vm1629_vm0, %v1628_v35  ;;  %1274 = vmatpush3.bf16.msra.mxu1 %v1358_v1 }
 0x17f   :  { %1275 = vmatprep.subr.bf16.mxu1 %v1628_v35 }
 0x182   :  { %1276 = vmatpush3.bf16.msra.mxu1 %v1359_v2 }
 0x183   :  { %1277 = vmatprep.subr.bf16.mxu1 %v1628_v35 }
 0x186   :  { %1278 = vmatpush3.bf16.msra.mxu1 %v1360_v3 }
 0x187   :  { %1279 = vmatprep.subr.bf16.mxu1 %v1628_v35 }
 0x18a   :  { %1280 = vmatpush3.bf16.msra.mxu1 %v1361_v4 }
 0x18b   :  { %1281 = vmatprep.subr.bf16.mxu1 %v1628_v35 }
 0x18e   :  { %1282 = vmatpush3.bf16.msra.mxu1 %v1362_v5  ;;  %v1401_v5 = vld [vmem:[#allocation13 + $0x28] sm:$0xff]  }
 0x18f   :  { %1283 = vmatprep.subr.bf16.mxu1 %v1628_v35 }
 0x192   :  { %1284 = vmatpush3.bf16.msra.mxu1 %v1363_v6  ;;  %v1402_v6 = vld [vmem:[#allocation13 + $0x70] sm:$0xff]  }
 0x193   :  { %1285 = vmatprep.subr.bf16.mxu1 %v1628_v35 }
 0x196   :  { %1286 = vmatpush3.bf16.msra.mxu1 %v1364_v19 }
 0x197   :  { %1287 = vmatprep.subr.bf16.mxu1 %v1628_v35 }
 0x19a   :  { %1288 = vmatpush3.bf16.msra.mxu1 %v1365_v20 }
 0x19b   :  { %1231 = vmatprep.subr.bf16.mxu1 %v1390_v47 }
 0x250   :  { %v1207_v7 = vpop.f32.mrb[0].mxu1 }
 0x251   :  { %v1208_v9 = vpop.f32.mrb[1].mxu1 }
 0x252   :  { %v1209_v10 = vadd.f32 %v1208_v9, %v1207_v7  ;;  %v1210_v11 = vpop.f32.mrb[2].mxu1  ;;  %v1403_v7 = vld [vmem:[#allocation13 + $0x30] sm:$0xff]   ;;  %v1405_v9 = vld [vmem:[#allocation13 + $0x38] sm:$0xff]  }
 0x253   :  { %v1211_v12 = vpop.f32.mrb[3].mxu1 }
 0x254   :  { %v479_v13 = vadd.f32 %v1209_v10, %v1114_v8  ;;  %v1212_v14 = vadd.f32 %v1211_v12, %v1210_v11  ;;  %v734_v10 = vld [vmem:[%s1902_s10] sm:$0x3]  ;;  %s1630_s10 = smov [#allocation15]  }
 0x255   :  { %v739_v11 = vrot.slane %v734_v10, %v166_v42  ;;  %v743_v12 = vrot.slane %v734_v10, %v170_v44  ;;  %s1078_s3 = sshll.u32 %s1630_s10, 4  ;;  %s1079_s3 = int_to_ptr.vmem [resolvable:$true] %s1078_s3 }
 0x256   :  { %v482_v15 = vadd.f32 %v1212_v14, %v1114_v8  ;;  %v485_v16 = vmax.f32 %v479_v13, 0.0  ;;  %v1404_v8 = vld [vmem:[#allocation13 + $0x78] sm:$0xff]   ;;  %s1560_s29 = scalar_lea.vmem %s1079_s3, 256  ;;  %p1565_p1 = scmp.lt.s32.totalorder %s1079_s3, %s1079_s3 }
 0x257   :  { %p1561_p0 = scmp.ne.s32.totalorder %s1079_s3, %s1560_s29  ;;  %p1566_p2 = scmp.lt.s32.totalorder %s1560_s29, %s1560_s29 }
 0x258   :  { %v486_v17 = vmax.f32 %v482_v15, 0.0 }
 0x259   :  { %p1567_p3 = por %p1566_p2, %p1565_p1 }
 0x25a   :  { %v487_v18 = vpack.c.bf16 %v486_v17, %v485_v16 }
 0x25b   :  { %p1568_p4 = pnand %p1567_p3, %p1561_p0 }
 0x25c   :  { %1270 = vmatmul.mubr.bf16.vlgmr.msra.gmra.mrb[4].mxu0 %v487_v18 }
 0x25d   :  { %858 = vmatprep.mubr.bf16.mxu0 %v1627_v0  ;;  %827 = vmatpush1.bf16.msra.mxu0 %v1366_v21  ;;  %v1375_v0 = vld [vmem:[#allocation11 + $0x30] ss:$8 sps:$4 sm:$0xff]  }
 0x25e   :  { %828 = vmatprep.subr.bf16.mxu0 %v1371_v23 }
 0x261   :  { %829 = vmatpush1.bf16.msra.mxu0 %v1369_v24 }
 0x262   :  { %830 = vmatprep.subr.bf16.mxu0 %v1374_v25 }
 0x265   :  { %831 = vmatpush1.bf16.msra.mxu0 %v1372_v26 }
 0x266   :  { %832 = vmatprep.subr.bf16.mxu0 %v1377_v27 }
 0x269   :  { %833 = vmatpush1.bf16.msra.mxu0 %v1375_v0 }
 0x26a   :  { %834 = vmatprep.subr.bf16.mxu0 %v1380_v28 }
 0x26d   :  { %835 = vmatpush1.bf16.msra.mxu0 %v1378_v29 }
 0x26e   :  { %836 = vmatprep.subr.bf16.mxu0 %v1383_v30 }
 0x271   :  { %837 = vmatpush1.bf16.msra.mxu0 %v1381_v31 }
 0x272   :  { %838 = vmatprep.subr.bf16.mxu0 %v1386_v40 }
 0x275   :  { %839 = vmatpush1.bf16.msra.mxu0 %v1384_v43 }
 0x276   :  { %840 = vmatprep.subr.bf16.mxu0 %v1389_v45 }
 0x279   :  { %841 = vmatpush1.bf16.msra.mxu0 %v1387_v46 }
 0x32f   :  { %v593_v33 = vpop.f32.mrb[4].mxu0 }
 0x330   :  { %v594_v34 = vadd.f32 %v1131_v32, %v593_v33  ;;  %v1271_v35 = vpop.f32.mrb[5].mxu0 }
 0x331   :  { %v596_v36 = vpop.f32.mrb[6].mxu0 }
 0x332   :  { %600 = vst [vmem:[#allocation15] sm:$0xff] %v594_v34  ;;  %v597_v37 = vadd.f32 %v1131_v32, %v596_v36  ;;  %v1272_v38 = vpop.f32.mrb[7].mxu0 }
 0x334   :  { %601 = vst [vmem:[#allocation15 + $0x8] sm:$0xff] %v597_v37  ;;  %v602_v39 = vpack.c.bf16 %v597_v37, %v594_v34 }
 0x336   :  { %1290 = vmatmul.mubr.bf16.vlgmr.msra.gmra.mrb[4].mxu1 %v602_v39 }
 0x337   :  { %1232 = vmatpush3.bf16.msra.mxu1 %v1391_v48 }
 0x338   :  { %1233 = vmatprep.subr.bf16.mxu1 %v1392_v49 }
 0x33b   :  { %1234 = vmatpush3.bf16.msra.mxu1 %v1393_v50 }
 0x33c   :  { %1235 = vmatprep.subr.bf16.mxu1 %v1394_v51 }
 0x33f   :  { %1236 = vmatpush3.bf16.msra.mxu1 %v1395_v52 }
 0x340   :  { %1237 = vmatprep.subr.bf16.mxu1 %v1396_v53 }
 0x343   :  { %1238 = vmatpush3.bf16.msra.mxu1 %v1397_v54 }
 0x344   :  { %1239 = vmatprep.subr.bf16.mxu1 %v1398_v55 }
 0x347   :  { %1240 = vmatpush3.bf16.msra.mxu1 %v1399_v56 }
 0x348   :  { %1241 = vmatprep.subr.bf16.mxu1 %v1400_v57 }
 0x34b   :  { %1242 = vmatpush3.bf16.msra.mxu1 %v1401_v5 }
 0x34c   :  { %1243 = vmatprep.subr.bf16.mxu1 %v1402_v6 }
 0x34f   :  { %1244 = vmatpush3.bf16.msra.mxu1 %v1403_v7 }
 0x350   :  { %1245 = vmatprep.subr.bf16.mxu1 %v1404_v8 }
 0x353   :  { %1246 = vmatpush3.bf16.msra.mxu1 %v1405_v9 }
 0x409   :  { %v708_v59 = vpop.f32.mrb[4].mxu1 }
 0x40a   :  { %v709_v60 = vadd.f32 %v1140_v58, %v708_v59  ;;  %v1291_v61 = vpop.f32.mrb[5].mxu1 }
 0x40b   :  { %v711_v62 = vpop.f32.mrb[6].mxu1 }
 0x40c   :  { %v712_v63 = vadd.f32 %v1140_v58, %v711_v62  ;;  %v1292_v1 = vpop.f32.mrb[7].mxu1  ;;  %v715_v2 = vmax.f32 %v709_v60, 0.0 }
 0x40e   :  { %v716_v3 = vmax.f32 %v712_v63, 0.0 }
 0x410   :  { %v717_v4 = vpack.c.bf16 %v716_v3, %v715_v2 }
 0x412   :  { %859 = vmatmul.mubr.bf16.vlgmr.msra.gmra.mrb[8].mxu0 %v717_v4 }
 0x4e5   :  { %v860_v13 = vpop.f32.mrb[8].mxu0 }
 0x4e6   :  { %v861_v14 = vadd.f32 %v860_v13, %v739_v11  ;;  %v862_v15 = vpop.f32.mrb[9].mxu0 }
 0x4e7   :  { %v863_v16 = vadd.f32 %v862_v15, %v743_v12  ;;  %v864_v17 = vpop.f32.mrb[10].mxu0 }
 0x4e8   :  { %v865_v18 = vadd.f32 %v864_v17, %v739_v11  ;;  %v866_v19 = vpop.f32.mrb[11].mxu0  ;;  %v869_v21 = vmax.f32 %v861_v14, 0.0 }
 0x4e9   :  { %v867_v20 = vadd.f32 %v866_v19, %v743_v12  ;;  %v870_v23 = vmax.f32 %v863_v16, 0.0 }
 0x4ea   :  { %v871_v22 = vmax.f32 %v865_v18, 0.0 }
 0x4eb   :  { %v872_v24 = vmax.f32 %v867_v20, 0.0 }
 0x4ec   :  { %v873_v25 = vpack.c.bf16 %v871_v22, %v869_v21 }
 0x4ed   :  { %v874_v26 = vpack.c.bf16 %v872_v24, %v870_v23 }
 0x4ef   :  { %1042 = vmatprep.mubr.bf16.mxu1 %v874_v26 }
 0x4f0   :  { %1043 = vmatmul.mubr.bf16.vlgmr.msra.gmra.mrb[8].mxu1 %v873_v25 }
 0x4f1   :  { %1571 = shalt.err (!%p1568_p4)
}
 0x4f2   :  { %s1572_s0 = scalar_lea.hbm %s1906_s14, 256 }
 0x4f3   :  { %p1573_p5 = scmp.ne.s32.totalorder %s1906_s14, %s1572_s0  ;;  %p1576_p6 = scmp.lt.u32.totalorder %s1572_s0, %s1906_s14 }
 0x4f5   :  { %p1578_p7 = pnand %p1576_p6, %p1573_p5 }
 0x4f7   :  { %1581 = shalt.err (!%p1578_p7)
}
 0x4f8   :  { %1084 = dma.vmem_to_hbm [thread:$0]  %s1079_s3, 256, %s1906_s14, [#allocation16], %s1617_s23, %s1617_s23, %s1618_s24  }
 0x4f9   :  { %v1165_v0 = vld [vmem:[%s1904_s12] ss:$0 sm:$0xff]  ;;  %s1631_s11 = smov [#allocation14]  }
 0x4fa   :  { %s1066_s15 = sshll.u32 %s1631_s11, 4  ;;  %s1067_s15 = int_to_ptr.vmem [resolvable:$true] %s1066_s15 }
 0x4fb   :  { %s1582_s2 = scalar_lea.vmem %s1067_s15, 128  ;;  %p1587_p9 = scmp.lt.s32.totalorder %s1067_s15, %s1067_s15 }
 0x4fc   :  { %p1583_p8 = scmp.ne.s32.totalorder %s1067_s15, %s1582_s2  ;;  %p1588_p10 = scmp.lt.s32.totalorder %s1582_s2, %s1582_s2 }
 0x4fe   :  { %p1589_p11 = por %p1588_p10, %p1587_p9 }
 0x500   :  { %p1590_p12 = pnand %p1589_p11, %p1583_p8 }
 0x5c3   :  { %v1247_v41 = vpop.f32.mrb[8].mxu1 }
 0x5c4   :  { %v1248_v42 = vpop.f32.mrb[9].mxu1 }
 0x5c5   :  { %v1249_v44 = vadd.f32 %v1248_v42, %v1247_v41  ;;  %v1250_v27 = vpop.f32.mrb[10].mxu1 }
 0x5c6   :  { %v1251_v28 = vpop.f32.mrb[11].mxu1 }
 0x5c7   :  { %v1252_v29 = vadd.f32 %v1251_v28, %v1250_v27  ;;  %v1045_v30 = vadd.f32 %v1249_v44, %v1165_v0 }
 0x5c9   :  { %v1048_v31 = vadd.f32 %v1252_v29, %v1165_v0 }
 0x5cb   :  { %v1189_v32 = vpack.c.bf16 %v1048_v31, %v1045_v30 }
 0x5cd   :  { %1190 = vst [vmem:[#allocation14] sm:$0xff] %v1189_v32  }
 0x5ce   :  { %1593 = shalt.err (!%p1590_p12)
}
 0x5cf   :  { %s1594_s12 = scalar_lea.hbm %s1905_s13, 128 }
 0x5d0   :  { %p1595_p13 = scmp.ne.s32.totalorder %s1905_s13, %s1594_s12  ;;  %p1598_p0 = scmp.lt.u32.totalorder %s1594_s12, %s1905_s13 }
 0x5d2   :  { %p1600_p1 = pnand %p1598_p0, %p1595_p13 }
 0x5d4   :  { %1603 = shalt.err (!%p1600_p1)
}
 0x5d5   :  { %1072 = dma.vmem_to_hbm [thread:$0]  %s1067_s15, 128, %s1905_s13, [#allocation4], %s1621_s30, %s1621_s30, %s1622_s25  }
 0x5d6   :  { %1612 = dma.done.wait [#allocation4], 128  }
 0x5d7   :  { %1613 = vsyncadd [#allocation4], 4294967168 }
 0x5d8   :  { %1614 = dma.done.wait [#allocation16], 256  }
 0x5d9   :  { %1615 = vsyncadd [#allocation16], 4294967040 }
 0x5da   :  { %1091 = vsyncpa [#allocation3], 1 }
 0x5db   :  { %1092 = vsyncpa [#allocation6], 1 }
 0x5dc   :  { %1093 = vsyncpa [#allocation9], 1 }
 0x5dd   :  { %1094 = vsyncpa [#allocation12], 1 }
 0x5de   :  { %1095 = vsyncpa [#allocation4], 1 }
 0x5df   :  { %1096 = vsyncpa [#allocation16], 1 }

// kernel: tpu_custom_call.1
= control target key start
LH: loop header
LB: loop body
LE: loop exit
PB: predicated region body
PF: predicated region fallthrough
CT: control target
= control target key end

     0   :  { %20 = vsyncpa [#allocation3], 0  ;;  %s1892_s0 = inlined_call_operand.hbm [shape: bf16[16,128], index: 0, kind: input, shape index: {}]   ;;  %s1893_s1 = inlined_call_operand.hbm [shape: bf16[128,256], index: 1, kind: input, shape index: {}]   ;;  %s1894_s2 = inlined_call_operand.vmem [shape: f32[1,256], index: 2, kind: input, shape index: {}]   ;;  %s1895_s3 = inlined_call_operand.hbm [shape: bf16[256,128], index: 3, kind: input, shape index: {}]   ;;  %s1896_s4 = inlined_call_operand.vmem [shape: f32[1,128], index: 4, kind: input, shape index: {}]   ;;  %s1897_s5 = inlined_call_operand.hbm [shape: bf16[128,128], index: 5, kind: input, shape index: {}]   ;;  %s1898_s6 = inlined_call_operand.vmem [shape: f32[1,128], index: 6, kind: input, shape index: {}]   ;;  %s1899_s7 = inlined_call_operand.hbm [shape: bf16[128,128], index: 7, kind: input, shape index: {}]   ;;  %s1900_s8 = inlined_call_operand.vmem [shape: f32[1,128], index: 8, kind: input, shape index: {}]   ;;  %s1901_s9 = inlined_call_operand.hbm [shape: bf16[128,256], index: 9, kind: input, shape index: {}]   ;;  %s1902_s10 = inlined_call_operand.vmem [shape: f32[1,256], index: 10, kind: input, shape index: {}]   ;;  %s1903_s11 = inlined_call_operand.hbm [shape: bf16[256,128], index: 11, kind: input, shape index: {}]   ;;  %s1904_s12 = inlined_call_operand.vmem [shape: f32[1,128], index: 12, kind: input, shape index: {}]   ;;  %s1905_s13 = inlined_call_operand.hbm [shape: bf16[16,128], index: 13, kind: output, shape index: {0}]   ;;  %s1906_s14 = inlined_call_operand.hbm [shape: f32[16,128], index: 14, kind: output, shape index: {1}]  }
   0x1   :  { %21 = vsyncpa [#allocation6], 0 }
   0x2   :  { %22 = vsyncpa [#allocation9], 0 }
   0x3   :  { %23 = vsyncpa [#allocation12], 0 }
   0x4   :  { %24 = vsyncpa [#allocation4], 0 }
   0x5   :  { %25 = vsyncpa [#allocation16], 0  ;;  %s1616_s29 = smov [#allocation5]   ;;  %s1406_s17 = scalar_lea.hbm %s1893_s1, 2048 }
   0x6   :  { %s43_s30 = sshll.u32 %s1616_s29, 4  ;;  %p1407_p0 = scmp.ne.s32.totalorder %s1893_s1, %s1406_s17  ;;  %s44_s30 = int_to_ptr.vmem [resolvable:$true] %s43_s30 }
   0x7   :  { %p1410_p1 = scmp.lt.u32.totalorder %s1406_s17, %s1893_s1 }
   0x9   :  { %p1412_p2 = pnand %p1410_p1, %p1407_p0 }
   0xb   :  { %1415 = shalt.err (!%p1412_p2)
}
   0xc   :  { %s1416_s22 = scalar_lea.vmem %s44_s30, 2048  ;;  %p1421_p4 = scmp.lt.s32.totalorder %s44_s30, %s44_s30 }
   0xd   :  { %p1417_p3 = scmp.ne.s32.totalorder %s44_s30, %s1416_s22  ;;  %p1422_p5 = scmp.lt.s32.totalorder %s1416_s22, %s1416_s22 }
   0xf   :  { %p1423_p6 = por %p1422_p5, %p1421_p4 }
  0x11   :  { %p1424_p7 = pnand %p1423_p6, %p1417_p3 }
  0x13   :  { %1427 = shalt.err (!%p1424_p7)
}
  0x14   :  { %s1617_s23 = smov 128   ;;  %s1618_s24 = smov 8  }
  0x15   :  { %49 = dma.hbm_to_vmem [thread:$0]  %s1893_s1, 2048, %s44_s30, [#allocation6], %s1617_s23, %s1617_s23, %s1618_s24  }
  0x16   :  { %s1619_s27 = smov [#allocation8]   ;;  %s1620_s29 = smov [#allocation11]  }
  0x17   :  { %s71_s28 = sshll.u32 %s1619_s27, 4  ;;  %s99_s15 = sshll.u32 %s1620_s29, 4  ;;  %s72_s28 = int_to_ptr.vmem [resolvable:$true] %s71_s28  ;;  %s100_s15 = int_to_ptr.vmem [resolvable:$true] %s99_s15 }
  0x18   :  { %s1428_s18 = scalar_lea.hbm %s1897_s5, 1024 }
  0x19   :  { %p1429_p8 = scmp.ne.s32.totalorder %s1897_s5, %s1428_s18  ;;  %p1432_p9 = scmp.lt.u32.totalorder %s1428_s18, %s1897_s5 }
  0x1b   :  { %p1434_p10 = pnand %p1432_p9, %p1429_p8 }
  0x1d   :  { %1437 = shalt.err (!%p1434_p10)
}
  0x1e   :  { %s1438_s1 = scalar_lea.vmem %s72_s28, 1024  ;;  %p1443_p12 = scmp.lt.s32.totalorder %s72_s28, %s72_s28 }
  0x1f   :  { %p1439_p11 = scmp.ne.s32.totalorder %s72_s28, %s1438_s1  ;;  %p1444_p13 = scmp.lt.s32.totalorder %s1438_s1, %s1438_s1 }
  0x21   :  { %p1445_p0 = por %p1444_p13, %p1443_p12 }
  0x23   :  { %p1446_p1 = pnand %p1445_p0, %p1439_p11 }
  0x25   :  { %1449 = shalt.err (!%p1446_p1)
}
  0x26   :  { %s1621_s30 = smov 64   ;;  %s1622_s25 = smov 4  }
  0x27   :  { %77 = dma.hbm_to_vmem [thread:$0]  %s1897_s5, 1024, %s72_s28, [#allocation9], %s1621_s30, %s1621_s30, %s1622_s25  }
  0x28   :  { %s1450_s17 = scalar_lea.hbm %s1901_s9, 2048 }
  0x29   :  { %p1451_p2 = scmp.ne.s32.totalorder %s1901_s9, %s1450_s17  ;;  %p1454_p3 = scmp.lt.u32.totalorder %s1450_s17, %s1901_s9 }
  0x2b   :  { %p1456_p4 = pnand %p1454_p3, %p1451_p2 }
  0x2d   :  { %1459 = shalt.err (!%p1456_p4)
}
  0x2e   :  { %s1460_s22 = scalar_lea.vmem %s100_s15, 2048  ;;  %p1465_p6 = scmp.lt.s32.totalorder %s100_s15, %s100_s15 }
  0x2f   :  { %p1461_p5 = scmp.ne.s32.totalorder %s100_s15, %s1460_s22  ;;  %p1466_p7 = scmp.lt.s32.totalorder %s1460_s22, %s1460_s22 }
  0x31   :  { %p1467_p8 = por %p1466_p7, %p1465_p6 }
  0x33   :  { %p1468_p9 = pnand %p1467_p8, %p1461_p5 }
  0x35   :  { %1471 = shalt.err (!%p1468_p9)
}
  0x36   :  { %105 = dma.hbm_to_vmem [thread:$0]  %s1901_s9, 2048, %s100_s15, [#allocation12], %s1617_s23, %s1617_s23, %s1618_s24  }
  0x37   :  { %s1623_s1 = smov [#allocation2]   ;;  %s1624_s27 = smov [#allocation7]  }
  0x38   :  { %s31_s26 = sshll.u32 %s1623_s1, 4  ;;  %s57_s29 = sshll.u32 %s1624_s27, 4  ;;  %s32_s26 = int_to_ptr.vmem [resolvable:$true] %s31_s26  ;;  %s58_s29 = int_to_ptr.vmem [resolvable:$true] %s57_s29 }
  0x39   :  { %s1472_s18 = scalar_lea.hbm %s1892_s0, 128 }
  0x3a   :  { %p1473_p10 = scmp.ne.s32.totalorder %s1892_s0, %s1472_s18  ;;  %p1476_p11 = scmp.lt.u32.totalorder %s1472_s18, %s1892_s0 }
  0x3c   :  { %p1478_p12 = pnand %p1476_p11, %p1473_p10 }
  0x3e   :  { %1481 = shalt.err (!%p1478_p12)
}
  0x3f   :  { %s1482_s9 = scalar_lea.vmem %s32_s26, 128  ;;  %p1487_p0 = scmp.lt.s32.totalorder %s32_s26, %s32_s26 }
  0x40   :  { %p1483_p13 = scmp.ne.s32.totalorder %s32_s26, %s1482_s9  ;;  %p1488_p1 = scmp.lt.s32.totalorder %s1482_s9, %s1482_s9 }
  0x42   :  { %p1489_p2 = por %p1488_p1, %p1487_p0 }
  0x44   :  { %p1490_p3 = pnand %p1489_p2, %p1483_p13 }
  0x46   :  { %1493 = shalt.err (!%p1490_p3)
}
  0x47   :  { %37 = dma.hbm_to_vmem [thread:$0]  %s1892_s0, 128, %s32_s26, [#allocation3], %s1621_s30, %s1621_s30, %s1622_s25  }
  0x48   :  { %s1494_s27 = scalar_lea.hbm %s1895_s3, 2048 }
  0x49   :  { %p1495_p4 = scmp.ne.s32.totalorder %s1895_s3, %s1494_s27  ;;  %p1498_p5 = scmp.lt.u32.totalorder %s1494_s27, %s1895_s3 }
  0x4b   :  { %p1500_p6 = pnand %p1498_p5, %p1495_p4 }
  0x4d   :  { %1503 = shalt.err (!%p1500_p6)
}
  0x4e   :  { %s1504_s20 = scalar_lea.vmem %s58_s29, 2048  ;;  %p1509_p8 = scmp.lt.s32.totalorder %s58_s29, %s58_s29 }
  0x4f   :  { %p1505_p7 = scmp.ne.s32.totalorder %s58_s29, %s1504_s20  ;;  %p1510_p9 = scmp.lt.s32.totalorder %s1504_s20, %s1504_s20 }
  0x51   :  { %p1511_p10 = por %p1510_p9, %p1509_p8 }
  0x53   :  { %p1512_p11 = pnand %p1511_p10, %p1505_p7 }
  0x55   :  { %1515 = shalt.err (!%p1512_p11)
}
  0x56   :  { %63 = dma.hbm_to_vmem [thread:$0]  %s1895_s3, 2048, %s58_s29, [#allocation6], %s1621_s30, %s1621_s30, %s1622_s25  }
  0x57   :  { %s1625_s21 = smov [#allocation10]   ;;  %s1626_s9 = smov [#allocation13]  }
  0x58   :  { %s85_s22 = sshll.u32 %s1625_s21, 4  ;;  %s113_s15 = sshll.u32 %s1626_s9, 4  ;;  %s86_s22 = int_to_ptr.vmem [resolvable:$true] %s85_s22  ;;  %s114_s15 = int_to_ptr.vmem [resolvable:$true] %s113_s15 }
  0x59   :  { %s1516_s1 = scalar_lea.hbm %s1899_s7, 1024 }
  0x5a   :  { %p1517_p12 = scmp.ne.s32.totalorder %s1899_s7, %s1516_s1  ;;  %p1520_p13 = scmp.lt.u32.totalorder %s1516_s1, %s1899_s7 }
  0x5c   :  { %p1522_p0 = pnand %p1520_p13, %p1517_p12 }
  0x5e   :  { %1525 = shalt.err (!%p1522_p0)
}
  0x5f   :  { %s1526_s3 = scalar_lea.vmem %s86_s22, 1024  ;;  %p1531_p2 = scmp.lt.s32.totalorder %s86_s22, %s86_s22 }
  0x60   :  { %p1527_p1 = scmp.ne.s32.totalorder %s86_s22, %s1526_s3  ;;  %p1532_p3 = scmp.lt.s32.totalorder %s1526_s3, %s1526_s3 }
  0x62   :  { %p1533_p4 = por %p1532_p3, %p1531_p2 }
  0x64   :  { %p1534_p5 = pnand %p1533_p4, %p1527_p1 }
  0x66   :  { %1537 = shalt.err (!%p1534_p5)
}
  0x67   :  { %91 = dma.hbm_to_vmem [thread:$0]  %s1899_s7, 1024, %s86_s22, [#allocation9], %s1621_s30, %s1621_s30, %s1622_s25  }
  0x68   :  { %s1538_s26 = scalar_lea.hbm %s1903_s11, 2048 }
  0x69   :  { %p1539_p6 = scmp.ne.s32.totalorder %s1903_s11, %s1538_s26  ;;  %p1542_p7 = scmp.lt.u32.totalorder %s1538_s26, %s1903_s11 }
  0x6b   :  { %p1544_p8 = pnand %p1542_p7, %p1539_p6 }
  0x6d   :  { %1547 = shalt.err (!%p1544_p8)
}
  0x6e   :  { %s1548_s1 = scalar_lea.vmem %s114_s15, 2048  ;;  %p1553_p10 = scmp.lt.s32.totalorder %s114_s15, %s114_s15 }
  0x6f   :  { %p1549_p9 = scmp.ne.s32.totalorder %s114_s15, %s1548_s1  ;;  %p1554_p11 = scmp.lt.s32.totalorder %s1548_s1, %s1548_s1 }
  0x71   :  { %p1555_p12 = por %p1554_p11, %p1553_p10 }
  0x73   :  { %p1556_p13 = pnand %p1555_p12, %p1549_p9 }
  0x75   :  { %1559 = shalt.err (!%p1556_p13)
}
  0x76   :  { %119 = dma.hbm_to_vmem [thread:$0]  %s1903_s11, 2048, %s114_s15, [#allocation12], %s1621_s30, %s1621_s30, %s1622_s25  }
  0x77   :  { %1604 = dma.done.wait [#allocation3], 128  }
  0x78   :  { %1605 = vsyncadd [#allocation3], 4294967168 }
  0x79   :  { %1606 = dma.done.wait [#allocation6], 4096  }
  0x7a   :  { %1607 = vsyncadd [#allocation6], 4294963200 }
  0x7b   :  { %1608 = dma.done.wait [#allocation9], 2048  }
  0x7c   :  { %1609 = vsyncadd [#allocation9], 4294965248 }
  0x7d   :  { %1610 = dma.done.wait [#allocation12], 4096  }
  0x7e   :  { %1611 = vsyncadd [#allocation12], 4294963200  ;;  %v1627_v0 = vmov 0   ;;  %v1309_v1 = vld [vmem:[#allocation5 + $0x4] ss:$8 sps:$4 sm:$0xff]   ;;  %v1338_v16 = vld [vmem:[#allocation7 + $0x50] sm:$0xff]   ;;  %v164_v40 = vlaneseq }
  0x7f   :  { %292 = vmatprep.mubr.bf16.mxu0 %v1627_v0  ;;  %v1311_v2 = vld [vmem:[#allocation5] ss:$8 sps:$4 sm:$0xff]   ;;  %260 = vmatprep.subr.bf16.mxu0 %v1309_v1  ;;  %v1312_v3 = vld [vmem:[#allocation5 + $0x14] ss:$8 sps:$4 sm:$0xff]   ;;  %v1314_v4 = vld [vmem:[#allocation5 + $0x10] ss:$8 sps:$4 sm:$0xff]  }
  0x80   :  { %261 = vmatpush1.bf16.msra.mxu0 %v1311_v2  ;;  %v1315_v5 = vld [vmem:[#allocation5 + $0x24] ss:$8 sps:$4 sm:$0xff]   ;;  %v1317_v6 = vld [vmem:[#allocation5 + $0x20] ss:$8 sps:$4 sm:$0xff]   ;;  %v1318_v7 = vld [vmem:[#allocation5 + $0x34] ss:$8 sps:$4 sm:$0xff]  }
  0x81   :  { %262 = vmatprep.subr.bf16.mxu0 %v1312_v3  ;;  %v1320_v8 = vld [vmem:[#allocation5 + $0x30] ss:$8 sps:$4 sm:$0xff]   ;;  %v1321_v9 = vld [vmem:[#allocation5 + $0x44] ss:$8 sps:$4 sm:$0xff]   ;;  %v1323_v11 = vld [vmem:[#allocation5 + $0x40] ss:$8 sps:$4 sm:$0xff]  }
  0x82   :  { %v1334_v10 = vld [vmem:[#allocation7 + $0x40] sm:$0xff]   ;;  %v1324_v13 = vld [vmem:[#allocation5 + $0x54] ss:$8 sps:$4 sm:$0xff]   ;;  %v1336_v14 = vld [vmem:[#allocation7 + $0x48] sm:$0xff]   ;;  %v1628_v35 = vmov 0.0   ;;  %v1820_v41 = vshrl.u32 %v164_v40, 7 }
  0x83   :  { %v1335_v12 = vld [vmem:[#allocation7] sm:$0xff]   ;;  %1191 = vmatprep.subr.bf16.mxu1 %v1334_v10  ;;  %v1337_v15 = vld [vmem:[#allocation7 + $0x8] sm:$0xff]   ;;  %v1326_v17 = vld [vmem:[#allocation5 + $0x50] ss:$8 sps:$4 sm:$0xff]   ;;  %vm1629_vm0 = vmmov 0  }
  0x84   :  { %263 = vmatpush1.bf16.msra.mxu0 %v1314_v4  ;;  %1192 = vmatpush3.bf16.msra.mxu1 %v1335_v12  ;;  %v1327_v18 = vld [vmem:[#allocation5 + $0x64] ss:$8 sps:$4 sm:$0xff]   ;;  %v1339_v19 = vld [vmem:[#allocation7 + $0x10] sm:$0xff]   ;;  %v1340_v20 = vld [vmem:[#allocation7 + $0x58] sm:$0xff]   ;;  %v166_v42 = vsub.s32 0, %v1820_v41  ;;  %v170_v44 = vsub.s32 1, %v1820_v41 }
  0x85   :  { %264 = vmatprep.subr.bf16.mxu0 %v1315_v5  ;;  %1193 = vmatprep.subr.bf16.mxu1 %v1336_v14  ;;  %v1329_v21 = vld [vmem:[#allocation5 + $0x60] ss:$8 sps:$4 sm:$0xff]   ;;  %v1330_v22 = vld [vmem:[#allocation5 + $0x74] ss:$8 sps:$4 sm:$0xff]   ;;  %v1332_v25 = vld [vmem:[#allocation5 + $0x70] ss:$8 sps:$4 sm:$0xff]  }
  0x86   :  { %v1341_v23 = vld [vmem:[#allocation7 + $0x18] sm:$0xff]   ;;  %v1342_v24 = vld [vmem:[#allocation7 + $0x60] sm:$0xff]   ;;  %v1344_v27 = vld [vmem:[#allocation7 + $0x68] sm:$0xff]  }
  0x87   :  { %v1343_v26 = vld [vmem:[#allocation7 + $0x20] sm:$0xff]   ;;  %v1333_v28 = vld [vmem:[#allocation2] sm:$0xff]   ;;  %v1345_v29 = vld [vmem:[#allocation7 + $0x28] sm:$0xff]  }
  0x88   :  { %265 = vmatpush1.bf16.msra.mxu0 %v1317_v6  ;;  %1194 = vmatpush3.bf16.msra.mxu1 %v1337_v15  ;;  %v1346_v30 = vld [vmem:[#allocation7 + $0x70] sm:$0xff]   ;;  %v1348_v32 = vld [vmem:[#allocation7 + $0x78] sm:$0xff]   ;;  %v1350_v34 = vld [vmem:[#allocation8] sm:$0xff]  }
  0x89   :  { %266 = vmatprep.subr.bf16.mxu0 %v1318_v7  ;;  %1195 = vmatprep.subr.bf16.mxu1 %v1338_v16  ;;  %v1347_v31 = vld [vmem:[#allocation7 + $0x30] sm:$0xff]   ;;  %v1349_v33 = vld [vmem:[#allocation7 + $0x38] sm:$0xff]   ;;  %v1351_v36 = vld [vmem:[#allocation8 + $0x8] sm:$0xff]  }
  0x8a   :  { %v1352_v37 = vld [vmem:[#allocation8 + $0x10] sm:$0xff]   ;;  %v1353_v38 = vld [vmem:[#allocation8 + $0x18] sm:$0xff]   ;;  %v1354_v39 = vld [vmem:[#allocation8 + $0x20] sm:$0xff]  }
  0x8b   :  { %v162_v43 = vld [vmem:[%s1894_s2] sm:$0x3]  ;;  %v1355_v61 = vld [vmem:[#allocation8 + $0x28] sm:$0xff]   ;;  %v1356_v62 = vld [vmem:[#allocation8 + $0x30] sm:$0xff]  }
  0x8c   :  { %267 = vmatpush1.bf16.msra.mxu0 %v1320_v8  ;;  %1196 = vmatpush3.bf16.msra.mxu1 %v1339_v19  ;;  %v167_v45 = vrot.slane %v162_v43, %v166_v42  ;;  %v171_v46 = vrot.slane %v162_v43, %v170_v44  ;;  %v1357_v63 = vld [vmem:[#allocation8 + $0x38] sm:$0xff]   ;;  %v1358_v1 = vld [vmem:[#allocation10] sm:$0xff]   ;;  %v1359_v2 = vld [vmem:[#allocation10 + $0x8] sm:$0xff]  }
  0x8d   :  { %268 = vmatprep.subr.bf16.mxu0 %v1321_v9  ;;  %1197 = vmatprep.subr.bf16.mxu1 %v1340_v20  ;;  %v1360_v3 = vld [vmem:[#allocation10 + $0x10] sm:$0xff]   ;;  %v1361_v4 = vld [vmem:[#allocation10 + $0x18] sm:$0xff]   ;;  %v1362_v5 = vld [vmem:[#allocation10 + $0x20] sm:$0xff]  }
  0x8e   :  { %v1363_v6 = vld [vmem:[#allocation10 + $0x28] sm:$0xff]   ;;  %v1114_v8 = vld [vmem:[%s1896_s4] ss:$0 sm:$0xff]  ;;  %v1364_v19 = vld [vmem:[#allocation10 + $0x30] sm:$0xff]  }
  0x8f   :  { %v1365_v20 = vld [vmem:[#allocation10 + $0x38] sm:$0xff]   ;;  %v1386_v40 = vld [vmem:[#allocation11 + $0x64] ss:$8 sps:$4 sm:$0xff]   ;;  %v1384_v43 = vld [vmem:[#allocation11 + $0x60] ss:$8 sps:$4 sm:$0xff]  }
  0x90   :  { %269 = vmatpush1.bf16.msra.mxu0 %v1323_v11  ;;  %1198 = vmatpush3.bf16.msra.mxu1 %v1341_v23  ;;  %v1371_v23 = vld [vmem:[#allocation11 + $0x14] ss:$8 sps:$4 sm:$0xff]  }
  0x91   :  { %270 = vmatprep.subr.bf16.mxu0 %v1324_v13  ;;  %1199 = vmatprep.subr.bf16.mxu1 %v1342_v24  ;;  %v1369_v24 = vld [vmem:[#allocation11 + $0x10] ss:$8 sps:$4 sm:$0xff]  }
  0x94   :  { %271 = vmatpush1.bf16.msra.mxu0 %v1326_v17  ;;  %1200 = vmatpush3.bf16.msra.mxu1 %v1343_v26  ;;  %v1372_v26 = vld [vmem:[#allocation11 + $0x20] ss:$8 sps:$4 sm:$0xff]  }
  0x95   :  { %272 = vmatprep.subr.bf16.mxu0 %v1327_v18  ;;  %1201 = vmatprep.subr.bf16.mxu1 %v1344_v27  ;;  %v1377_v27 = vld [vmem:[#allocation11 + $0x34] ss:$8 sps:$4 sm:$0xff]  }
  0x98   :  { %273 = vmatpush1.bf16.msra.mxu0 %v1329_v21  ;;  %1202 = vmatpush3.bf16.msra.mxu1 %v1345_v29  ;;  %v1366_v21 = vld [vmem:[#allocation11] ss:$8 sps:$4 sm:$0xff]  }
  0x99   :  { %274 = vmatprep.subr.bf16.mxu0 %v1330_v22  ;;  %1203 = vmatprep.subr.bf16.mxu1 %v1346_v30  ;;  %v1368_v22 = vld [vmem:[#allocation11 + $0x4] ss:$8 sps:$4 sm:$0xff]   ;;  %v1378_v29 = vld [vmem:[#allocation11 + $0x40] ss:$8 sps:$4 sm:$0xff]   ;;  %v1383_v30 = vld [vmem:[#allocation11 + $0x54] ss:$8 sps:$4 sm:$0xff]  }
  0x9c   :  { %275 = vmatpush1.bf16.msra.mxu0 %v1332_v25  ;;  %1204 = vmatpush3.bf16.msra.mxu1 %v1347_v31  ;;  %v1374_v25 = vld [vmem:[#allocation11 + $0x24] ss:$8 sps:$4 sm:$0xff]   ;;  %v1381_v31 = vld [vmem:[#allocation11 + $0x50] ss:$8 sps:$4 sm:$0xff]  }
  0x9d   :  { %1205 = vmatprep.subr.bf16.mxu1 %v1348_v32  ;;  %1253 = vmatprep.subr.bf16.mxu0 %v1628_v35  ;;  %v1131_v32 = vld [vmem:[%s1898_s6] ss:$0 sm:$0xff] }
  0x9f   :  { %293 = vmatmul.mubr.bf16.vlgmr.msra.gmra.mrb[0].mxu0 %v1333_v28  ;;  %v1380_v28 = vld [vmem:[#allocation11 + $0x44] ss:$8 sps:$4 sm:$0xff]  }
  0xa0   :  { %1206 = vmatpush3.bf16.msra.mxu1 %v1349_v33  ;;  %1254 = vmatpush3.bf16.msra.mxu0 %v1350_v34 }
  0xa1   :  { %1273 = vmatprep.subr.bf16.mxu1 %v1628_v35  ;;  %1255 = vmatprep.subr.bf16.mxu0 %v1628_v35 }
  0xa2   :  { %1269 = vmatprep.mubr.msk.bf16.mxu0 %vm1629_vm0, %v1628_v35 }
  0xa4   :  { %1256 = vmatpush3.bf16.msra.mxu0 %v1351_v36 }
  0xa5   :  { %1257 = vmatprep.subr.bf16.mxu0 %v1628_v35 }
  0xa8   :  { %1258 = vmatpush3.bf16.msra.mxu0 %v1352_v37 }
  0xa9   :  { %1259 = vmatprep.subr.bf16.mxu0 %v1628_v35 }
  0xac   :  { %1260 = vmatpush3.bf16.msra.mxu0 %v1353_v38 }
  0xad   :  { %1261 = vmatprep.subr.bf16.mxu0 %v1628_v35 }
  0xb0   :  { %1262 = vmatpush3.bf16.msra.mxu0 %v1354_v39 }
  0xb1   :  { %1263 = vmatprep.subr.bf16.mxu0 %v1628_v35 }
  0xb4   :  { %1264 = vmatpush3.bf16.msra.mxu0 %v1355_v61 }
  0xb5   :  { %1265 = vmatprep.subr.bf16.mxu0 %v1628_v35 }
  0xb8   :  { %1266 = vmatpush3.bf16.msra.mxu0 %v1356_v62 }
  0xb9   :  { %1267 = vmatprep.subr.bf16.mxu0 %v1628_v35 }
  0xbc   :  { %1268 = vmatpush3.bf16.msra.mxu0 %v1357_v63 }
  0xbd   :  { %826 = vmatprep.subr.bf16.mxu0 %v1368_v22 }
 0x172   :  { %v294_v47 = vpop.f32.mrb[0].mxu0 }
 0x173   :  { %v295_v48 = vadd.f32 %v294_v47, %v167_v45  ;;  %v296_v49 = vpop.f32.mrb[1].mxu0  ;;  %v1390_v47 = vld [vmem:[#allocation13 + $0x40] sm:$0xff]  }
 0x174   :  { %v297_v50 = vadd.f32 %v296_v49, %v171_v46  ;;  %v298_v51 = vpop.f32.mrb[2].mxu0  ;;  %v1392_v49 = vld [vmem:[#allocation13 + $0x48] sm:$0xff]  }
 0x175   :  { %v299_v52 = vadd.f32 %v298_v51, %v167_v45  ;;  %v300_v53 = vpop.f32.mrb[3].mxu0  ;;  %v303_v55 = vmax.f32 %v295_v48, 0.0  ;;  %v1389_v45 = vld [vmem:[#allocation11 + $0x74] ss:$8 sps:$4 sm:$0xff]   ;;  %v1391_v48 = vld [vmem:[#allocation13] sm:$0xff]  }
 0x176   :  { %v301_v54 = vadd.f32 %v300_v53, %v171_v46  ;;  %v304_v57 = vmax.f32 %v297_v50, 0.0  ;;  %v1387_v46 = vld [vmem:[#allocation11 + $0x70] ss:$8 sps:$4 sm:$0xff]   ;;  %v1393_v50 = vld [vmem:[#allocation13 + $0x8] sm:$0xff]  }
 0x177   :  { %v305_v56 = vmax.f32 %v299_v52, 0.0  ;;  %v1394_v51 = vld [vmem:[#allocation13 + $0x50] sm:$0xff]   ;;  %v1396_v53 = vld [vmem:[#allocation13 + $0x58] sm:$0xff]  }
 0x178   :  { %v306_v58 = vmax.f32 %v301_v54, 0.0  ;;  %v1395_v52 = vld [vmem:[#allocation13 + $0x10] sm:$0xff]   ;;  %v1397_v54 = vld [vmem:[#allocation13 + $0x18] sm:$0xff]  }
 0x179   :  { %v307_v59 = vpack.c.bf16 %v305_v56, %v303_v55  ;;  %v1398_v55 = vld [vmem:[#allocation13 + $0x60] sm:$0xff]  }
 0x17a   :  { %v308_v60 = vpack.c.bf16 %v306_v58, %v304_v57  ;;  %v1399_v56 = vld [vmem:[#allocation13 + $0x20] sm:$0xff]   ;;  %v1400_v57 = vld [vmem:[#allocation13 + $0x68] sm:$0xff]   ;;  %v1140_v58 = vld [vmem:[%s1900_s8] ss:$0 sm:$0xff] }
 0x17c   :  { %476 = vmatprep.mubr.bf16.mxu1 %v308_v60 }
 0x17d   :  { %477 = vmatmul.mubr.bf16.vlgmr.msra.gmra.mrb[0].mxu1 %v307_v59 }
 0x17e   :  { %1289 = vmatprep.mubr.msk.bf16.mxu1 %vm1629_vm0, %v1628_v35  ;;  %1274 = vmatpush3.bf16.msra.mxu1 %v1358_v1 }
 0x17f   :  { %1275 = vmatprep.subr.bf16.mxu1 %v1628_v35 }
 0x182   :  { %1276 = vmatpush3.bf16.msra.mxu1 %v1359_v2 }
 0x183   :  { %1277 = vmatprep.subr.bf16.mxu1 %v1628_v35 }
 0x186   :  { %1278 = vmatpush3.bf16.msra.mxu1 %v1360_v3 }
 0x187   :  { %1279 = vmatprep.subr.bf16.mxu1 %v1628_v35 }
 0x18a   :  { %1280 = vmatpush3.bf16.msra.mxu1 %v1361_v4 }
 0x18b   :  { %1281 = vmatprep.subr.bf16.mxu1 %v1628_v35 }
 0x18e   :  { %1282 = vmatpush3.bf16.msra.mxu1 %v1362_v5  ;;  %v1401_v5 = vld [vmem:[#allocation13 + $0x28] sm:$0xff]  }
 0x18f   :  { %1283 = vmatprep.subr.bf16.mxu1 %v1628_v35 }
 0x192   :  { %1284 = vmatpush3.bf16.msra.mxu1 %v1363_v6  ;;  %v1402_v6 = vld [vmem:[#allocation13 + $0x70] sm:$0xff]  }
 0x193   :  { %1285 = vmatprep.subr.bf16.mxu1 %v1628_v35 }
 0x196   :  { %1286 = vmatpush3.bf16.msra.mxu1 %v1364_v19 }
 0x197   :  { %1287 = vmatprep.subr.bf16.mxu1 %v1628_v35 }
 0x19a   :  { %1288 = vmatpush3.bf16.msra.mxu1 %v1365_v20 }
 0x19b   :  { %1231 = vmatprep.subr.bf16.mxu1 %v1390_v47 }
 0x250   :  { %v1207_v7 = vpop.f32.mrb[0].mxu1 }
 0x251   :  { %v1208_v9 = vpop.f32.mrb[1].mxu1 }
 0x252   :  { %v1209_v10 = vadd.f32 %v1208_v9, %v1207_v7  ;;  %v1210_v11 = vpop.f32.mrb[2].mxu1  ;;  %v1403_v7 = vld [vmem:[#allocation13 + $0x30] sm:$0xff]   ;;  %v1405_v9 = vld [vmem:[#allocation13 + $0x38] sm:$0xff]  }
 0x253   :  { %v1211_v12 = vpop.f32.mrb[3].mxu1 }
 0x254   :  { %v479_v13 = vadd.f32 %v1209_v10, %v1114_v8  ;;  %v1212_v14 = vadd.f32 %v1211_v12, %v1210_v11  ;;  %v734_v10 = vld [vmem:[%s1902_s10] sm:$0x3]  ;;  %s1630_s10 = smov [#allocation15]  }
 0x255   :  { %v739_v11 = vrot.slane %v734_v10, %v166_v42  ;;  %v743_v12 = vrot.slane %v734_v10, %v170_v44  ;;  %s1078_s3 = sshll.u32 %s1630_s10, 4  ;;  %s1079_s3 = int_to_ptr.vmem [resolvable:$true] %s1078_s3 }
 0x256   :  { %v482_v15 = vadd.f32 %v1212_v14, %v1114_v8  ;;  %v485_v16 = vmax.f32 %v479_v13, 0.0  ;;  %v1404_v8 = vld [vmem:[#allocation13 + $0x78] sm:$0xff]   ;;  %s1560_s29 = scalar_lea.vmem %s1079_s3, 256  ;;  %p1565_p1 = scmp.lt.s32.totalorder %s1079_s3, %s1079_s3 }
 0x257   :  { %p1561_p0 = scmp.ne.s32.totalorder %s1079_s3, %s1560_s29  ;;  %p1566_p2 = scmp.lt.s32.totalorder %s1560_s29, %s1560_s29 }
 0x258   :  { %v486_v17 = vmax.f32 %v482_v15, 0.0 }
 0x259   :  { %p1567_p3 = por %p1566_p2, %p1565_p1 }
 0x25a   :  { %v487_v18 = vpack.c.bf16 %v486_v17, %v485_v16 }
 0x25b   :  { %p1568_p4 = pnand %p1567_p3, %p1561_p0 }
 0x25c   :  { %1270 = vmatmul.mubr.bf16.vlgmr.msra.gmra.mrb[4].mxu0 %v487_v18 }
 0x25d   :  { %858 = vmatprep.mubr.bf16.mxu0 %v1627_v0  ;;  %827 = vmatpush1.bf16.msra.mxu0 %v1366_v21  ;;  %v1375_v0 = vld [vmem:[#allocation11 + $0x30] ss:$8 sps:$4 sm:$0xff]  }
 0x25e   :  { %828 = vmatprep.subr.bf16.mxu0 %v1371_v23 }
 0x261   :  { %829 = vmatpush1.bf16.msra.mxu0 %v1369_v24 }
 0x262   :  { %830 = vmatprep.subr.bf16.mxu0 %v1374_v25 }
 0x265   :  { %831 = vmatpush1.bf16.msra.mxu0 %v1372_v26 }
 0x266   :  { %832 = vmatprep.subr.bf16.mxu0 %v1377_v27 }
 0x269   :  { %833 = vmatpush1.bf16.msra.mxu0 %v1375_v0 }
 0x26a   :  { %834 = vmatprep.subr.bf16.mxu0 %v1380_v28 }
 0x26d   :  { %835 = vmatpush1.bf16.msra.mxu0 %v1378_v29 }
 0x26e   :  { %836 = vmatprep.subr.bf16.mxu0 %v1383_v30 }
 0x271   :  { %837 = vmatpush1.bf16.msra.mxu0 %v1381_v31 }
 0x272   :  { %838 = vmatprep.subr.bf16.mxu0 %v1386_v40 }
 0x275   :  { %839 = vmatpush1.bf16.msra.mxu0 %v1384_v43 }
 0x276   :  { %840 = vmatprep.subr.bf16.mxu0 %v1389_v45 }
 0x279   :  { %841 = vmatpush1.bf16.msra.mxu0 %v1387_v46 }
 0x32f   :  { %v593_v33 = vpop.f32.mrb[4].mxu0 }
 0x330   :  { %v594_v34 = vadd.f32 %v1131_v32, %v593_v33  ;;  %v1271_v35 = vpop.f32.mrb[5].mxu0 }
 0x331   :  { %v596_v36 = vpop.f32.mrb[6].mxu0 }
 0x332   :  { %600 = vst [vmem:[#allocation15] sm:$0xff] %v594_v34  ;;  %v597_v37 = vadd.f32 %v1131_v32, %v596_v36  ;;  %v1272_v38 = vpop.f32.mrb[7].mxu0 }
 0x334   :  { %601 = vst [vmem:[#allocation15 + $0x8] sm:$0xff] %v597_v37  ;;  %v602_v39 = vpack.c.bf16 %v597_v37, %v594_v34 }
 0x336   :  { %1290 = vmatmul.mubr.bf16.vlgmr.msra.gmra.mrb[4].mxu1 %v602_v39 }
 0x337   :  { %1232 = vmatpush3.bf16.msra.mxu1 %v1391_v48 }
 0x338   :  { %1233 = vmatprep.subr.bf16.mxu1 %v1392_v49 }
 0x33b   :  { %1234 = vmatpush3.bf16.msra.mxu1 %v1393_v50 }
 0x33c   :  { %1235 = vmatprep.subr.bf16.mxu1 %v1394_v51 }
 0x33f   :  { %1236 = vmatpush3.bf16.msra.mxu1 %v1395_v52 }
 0x340   :  { %1237 = vmatprep.subr.bf16.mxu1 %v1396_v53 }
 0x343   :  { %1238 = vmatpush3.bf16.msra.mxu1 %v1397_v54 }
 0x344   :  { %1239 = vmatprep.subr.bf16.mxu1 %v1398_v55 }
 0x347   :  { %1240 = vmatpush3.bf16.msra.mxu1 %v1399_v56 }
 0x348   :  { %1241 = vmatprep.subr.bf16.mxu1 %v1400_v57 }
 0x34b   :  { %1242 = vmatpush3.bf16.msra.mxu1 %v1401_v5 }
 0x34c   :  { %1243 = vmatprep.subr.bf16.mxu1 %v1402_v6 }
 0x34f   :  { %1244 = vmatpush3.bf16.msra.mxu1 %v1403_v7 }
 0x350   :  { %1245 = vmatprep.subr.bf16.mxu1 %v1404_v8 }
 0x353   :  { %1246 = vmatpush3.bf16.msra.mxu1 %v1405_v9 }
 0x409   :  { %v708_v59 = vpop.f32.mrb[4].mxu1 }
 0x40a   :  { %v709_v60 = vadd.f32 %v1140_v58, %v708_v59  ;;  %v1291_v61 = vpop.f32.mrb[5].mxu1 }
 0x40b   :  { %v711_v62 = vpop.f32.mrb[6].mxu1 }
 0x40c   :  { %v712_v63 = vadd.f32 %v1140_v58, %v711_v62  ;;  %v1292_v1 = vpop.f32.mrb[7].mxu1  ;;  %v715_v2 = vmax.f32 %v709_v60, 0.0 }
 0x40e   :  { %v716_v3 = vmax.f32 %v712_v63, 0.0 }
 0x410   :  { %v717_v4 = vpack.c.bf16 %v716_v3, %v715_v2 }
 0x412   :  { %859 = vmatmul.mubr.bf16.vlgmr.msra.gmra.mrb[8].mxu0 %v717_v4 }
 0x4e5   :  { %v860_v13 = vpop.f32.mrb[8].mxu0 }
 0x4e6   :  { %v861_v14 = vadd.f32 %v860_v13, %v739_v11  ;;  %v862_v15 = vpop.f32.mrb[9].mxu0 }
 0x4e7   :  { %v863_v16 = vadd.f32 %v862_v15, %v743_v12  ;;  %v864_v17 = vpop.f32.mrb[10].mxu0 }
 0x4e8   :  { %v865_v18 = vadd.f32 %v864_v17, %v739_v11  ;;  %v866_v19 = vpop.f32.mrb[11].mxu0  ;;  %v869_v21 = vmax.f32 %v861_v14, 0.0 }
 0x4e9   :  { %v867_v20 = vadd.f32 %v866_v19, %v743_v12  ;;  %v870_v23 = vmax.f32 %v863_v16, 0.0 }
 0x4ea   :  { %v871_v22 = vmax.f32 %v865_v18, 0.0 }
 0x4eb   :  { %v872_v24 = vmax.f32 %v867_v20, 0.0 }
 0x4ec   :  { %v873_v25 = vpack.c.bf16 %v871_v22, %v869_v21 }
 0x4ed   :  { %v874_v26 = vpack.c.bf16 %v872_v24, %v870_v23 }
 0x4ef   :  { %1042 = vmatprep.mubr.bf16.mxu1 %v874_v26 }
 0x4f0   :  { %1043 = vmatmul.mubr.bf16.vlgmr.msra.gmra.mrb[8].mxu1 %v873_v25 }
 0x4f1   :  { %1571 = shalt.err (!%p1568_p4)
}
 0x4f2   :  { %s1572_s0 = scalar_lea.hbm %s1906_s14, 256 }
 0x4f3   :  { %p1573_p5 = scmp.ne.s32.totalorder %s1906_s14, %s1572_s0  ;;  %p1576_p6 = scmp.lt.u32.totalorder %s1572_s0, %s1906_s14 }
 0x4f5   :  { %p1578_p7 = pnand %p1576_p6, %p1573_p5 }
 0x4f7   :  { %1581 = shalt.err (!%p1578_p7)
}
 0x4f8   :  { %1084 = dma.vmem_to_hbm [thread:$0]  %s1079_s3, 256, %s1906_s14, [#allocation16], %s1617_s23, %s1617_s23, %s1618_s24  }
 0x4f9   :  { %v1165_v0 = vld [vmem:[%s1904_s12] ss:$0 sm:$0xff]  ;;  %s1631_s11 = smov [#allocation14]  }
 0x4fa   :  { %s1066_s15 = sshll.u32 %s1631_s11, 4  ;;  %s1067_s15 = int_to_ptr.vmem [resolvable:$true] %s1066_s15 }
 0x4fb   :  { %s1582_s2 = scalar_lea.vmem %s1067_s15, 128  ;;  %p1587_p9 = scmp.lt.s32.totalorder %s1067_s15, %s1067_s15 }
 0x4fc   :  { %p1583_p8 = scmp.ne.s32.totalorder %s1067_s15, %s1582_s2  ;;  %p1588_p10 = scmp.lt.s32.totalorder %s1582_s2, %s1582_s2 }
 0x4fe   :  { %p1589_p11 = por %p1588_p10, %p1587_p9 }
 0x500   :  { %p1590_p12 = pnand %p1589_p11, %p1583_p8 }
 0x5c3   :  { %v1247_v41 = vpop.f32.mrb[8].mxu1 }
 0x5c4   :  { %v1248_v42 = vpop.f32.mrb[9].mxu1 }
 0x5c5   :  { %v1249_v44 = vadd.f32 %v1248_v42, %v1247_v41  ;;  %v1250_v27 = vpop.f32.mrb[10].mxu1 }
 0x5c6   :  { %v1251_v28 = vpop.f32.mrb[11].mxu1 }
 0x5c7   :  { %v1252_v29 = vadd.f32 %v1251_v28, %v1250_v27  ;;  %v1045_v30 = vadd.f32 %v1249_v44, %v1165_v0 }
 0x5c9   :  { %v1048_v31 = vadd.f32 %v1252_v29, %v1165_v0 }
 0x5cb   :  { %v1189_v32 = vpack.c.bf16 %v1048_v31, %v1045_v30 }
 0x5cd   :  { %1190 = vst [vmem:[#allocation14] sm:$0xff] %v1189_v32  }
 0x5ce   :  { %1593 = shalt.err (!%p1590_p12)
}
 0x5cf   :  { %s1594_s12 = scalar_lea.hbm %s1905_s13, 128 }
 0x5d0   :  { %p1595_p13 = scmp.ne.s32.totalorder %s1905_s13, %s1594_s12  ;;  %p1598_p0 = scmp.lt.u32.totalorder %s1594_s12, %s1905_s13 }
 0x5d2   :  { %p1600_p1 = pnand %p1598_p0, %p1595_p13 }
 0x5d4   :  { %1603 = shalt.err (!%p1600_p1)
}
 0x5d5   :  { %1072 = dma.vmem_to_hbm [thread:$0]  %s1067_s15, 128, %s1905_s13, [#allocation4], %s1621_s30, %s1621_s30, %s1622_s25  }
 0x5d6   :  { %1612 = dma.done.wait [#allocation4], 128  }
 0x5d7   :  { %1613 = vsyncadd [#allocation4], 4294967168 }
 0x5d8   :  { %1614 = dma.done.wait [#allocation16], 256  }
 0x5d9   :  { %1615 = vsyncadd [#allocation16], 4294967040 }
 0x5da   :  { %1091 = vsyncpa [#allocation3], 1 }
 0x5db   :  { %1092 = vsyncpa [#allocation6], 1 }
 0x5dc   :  { %1093 = vsyncpa [#allocation9], 1 }
 0x5dd   :  { %1094 = vsyncpa [#allocation12], 1 }
 0x5de   :  { %1095 = vsyncpa [#allocation4], 1 }
 0x5df   :  { %1096 = vsyncpa [#allocation16], 1 }

</bundles_post_ra>
